<compile_context>
chip_gen: v5e
topology: v5e:2x2
jax: 0.10.0
libtpu: 0.0.40
codegen_flags: <defaults>
</compile_context>

<pallas_src>
import functools

import numpy as np
import jax
import jax.numpy as jnp
from jax.experimental import pallas as pl
from jax.experimental.pallas import tpu as pltpu


def _round_up(x, m):
    return ((x + m - 1) // m) * m


# -----------------------------------------------------------------------------
# Pallas kernel: one layer, both directions interleaved, full time loop inside.
# -----------------------------------------------------------------------------
def _bilstm_layer_kernel(bs_ref,        # SMEM (T,) int32            (scalar prefetch)
                         x_ref,         # VMEM (T, B_pad, Din)       bf16
                         wih_ref,       # VMEM (Din, 8*HP)           bf16  [fwd | bwd]
                         whh_ref,       # VMEM (2, HP, 4*HP)         bf16
                         b_ref,         # VMEM (1, 8*HP)             f32   [fwd | bwd]
                         y_ref,         # VMEM (T, B_pad, 2*HP)      bf16  [y_f | y_b]
                         h_ref,         # VMEM (2, B_pad, HP)        f32   final h
                         c_ref,         # VMEM (2, B_pad, HP)        f32   final c
                         p_ref,         # VMEM scratch (T*B_pad, 8*HP) f32
                         *, seq_len, hidden_pad):
    T = seq_len
    HP = hidden_pad
    B_pad = x_ref.shape[1]
    Din = x_ref.shape[2]

    # ---- Hoisted input projection: one MXU-dense matmul for every timestep of
    # both directions, bias folded in once (outside the recurrence). ----
    x2d = x_ref[...].reshape(T * B_pad, Din)                       # merge leading dims
    p_ref[...] = (jnp.dot(x2d, wih_ref[...],
                          preferred_element_type=jnp.float32)
                  + b_ref[...])

    # Loop-invariant loads (hoisted out of the time loop).
    w_hh_f = whh_ref[0]                                            # (HP, 4*HP) bf16
    w_hh_b = whh_ref[1]
    row_ids = jax.lax.broadcasted_iota(jnp.int32, (B_pad, 1), 0)

    def cell(p_gates, h, c, w_hh, active):
        # Small recurrent matmul only: (B_pad, HP) x (HP, 4*HP), f32 accumulate.
        gates = p_gates + jnp.dot(h.astype(jnp.bfloat16), w_hh,
                                  preferred_element_type=jnp.float32)
        i_g = jax.nn.sigmoid(gates[:, 0 * HP:1 * HP])              # 128-aligned slices
        f_g = jax.nn.sigmoid(gates[:, 1 * HP:2 * HP])
        g_g = jnp.tanh(gates[:, 2 * HP:3 * HP])
        o_g = jax.nn.sigmoid(gates[:, 3 * HP:4 * HP])
        c_new = f_g * c + i_g * g_g
        h_new = o_g * jnp.tanh(c_new)
        # Finished / padded rows keep their previous state (hx_n bookkeeping of
        # layer_forward); their output rows are zeroed (never read when packed).
        h_u = jnp.where(active, h_new, h)
        c_u = jnp.where(active, c_new, c)
        y_t = jnp.where(active, h_new, 0.0)
        return h_u, c_u, y_t

    def step(s, carry):
        h_f, c_f, h_b, c_b = carry                                 # (B_pad, HP) f32 each
        t_f = s
        t_b = T - 1 - s
        rf = pl.multiple_of(t_f * B_pad, B_pad)
        rb = pl.multiple_of(t_b * B_pad, B_pad)
        p_f = p_ref[pl.ds(rf, B_pad), pl.ds(0, 4 * HP)]
        p_b = p_ref[pl.ds(rb, B_pad), pl.ds(4 * HP, 4 * HP)]
        act_f = row_ids < bs_ref[t_f]
        act_b = row_ids < bs_ref[t_b]
        # Two independent dependency chains per iteration -> MXU push of one
        # direction overlaps the EUP/VPU gate math of the other on 1-TC chips.
        h_f, c_f, y_f = cell(p_f, h_f, c_f, w_hh_f, act_f)
        h_b, c_b, y_b = cell(p_b, h_b, c_b, w_hh_b, act_b)
        y_ref[t_f, :, pl.ds(0, HP)] = y_f.astype(y_ref.dtype)
        y_ref[t_b, :, pl.ds(HP, HP)] = y_b.astype(y_ref.dtype)
        return (h_f, c_f, h_b, c_b)

    z = jnp.zeros((B_pad, HP), jnp.float32)
    h_f, c_f, h_b, c_b = jax.lax.fori_loop(0, T, step, (z, z, z, z))

    h_ref[0] = h_f
    h_ref[1] = h_b
    c_ref[0] = c_f
    c_ref[1] = c_b


def _vmem_limit_bytes(T, B_pad, Din, HP):
    blocks = (T * B_pad * Din * 2          # x (bf16)
              + Din * 8 * HP * 2           # W_ih (bf16)
              + 2 * HP * 4 * HP * 2        # W_hh (bf16)
              + 8 * HP * 4                 # bias (f32)
              + T * B_pad * 2 * HP * 2     # y (bf16)
              + 2 * 2 * B_pad * HP * 4)    # final h, c (f32)
    scratch = T * B_pad * 8 * HP * 4       # hoisted projection P (f32)
    est = 2 * blocks + scratch             # BlockSpec double-buffers each block
    return int(min(max(2 * est, 32 << 20), 64 << 20))


def bilstm_layer(x_pad, bs_arr, wih, whh, bias, hidden_pad):
    """One BiLSTM layer (both directions) in a single pallas_call.

    x_pad: (T, B_pad, Din) bf16   wih: (Din, 8*HP) bf16   whh: (2, HP, 4*HP) bf16
    bias:  (1, 8*HP) f32
    returns y (T, B_pad, 2*HP) bf16, h_n (2, B_pad, HP) f32, c_n (2, B_pad, HP) f32
    """
    T, B_pad, Din = x_pad.shape
    HP = hidden_pad
    kernel = functools.partial(_bilstm_layer_kernel, seq_len=T, hidden_pad=HP)
    return pl.pallas_call(
        kernel,
        out_shape=(
            jax.ShapeDtypeStruct((T, B_pad, 2 * HP), jnp.bfloat16),
            jax.ShapeDtypeStruct((2, B_pad, HP), jnp.float32),
            jax.ShapeDtypeStruct((2, B_pad, HP), jnp.float32),
        ),
        grid_spec=pltpu.PrefetchScalarGridSpec(
            num_scalar_prefetch=1,                       # batch_sizes -> SMEM
            grid=(1,),
            in_specs=[
                pl.BlockSpec((T, B_pad, Din), lambda i, bs: (0, 0, 0)),      # x
                pl.BlockSpec((Din, 8 * HP), lambda i, bs: (0, 0)),           # W_ih (both dirs)
                pl.BlockSpec((2, HP, 4 * HP), lambda i, bs: (0, 0, 0)),      # W_hh (both dirs)
                pl.BlockSpec((1, 8 * HP), lambda i, bs: (0, 0)),             # bias
            ],
            out_specs=[
                pl.BlockSpec((T, B_pad, 2 * HP), lambda i, bs: (0, 0, 0)),   # y (dir-concat)
                pl.BlockSpec((2, B_pad, HP), lambda i, bs: (0, 0, 0)),       # final h
                pl.BlockSpec((2, B_pad, HP), lambda i, bs: (0, 0, 0)),       # final c
            ],
            scratch_shapes=[pltpu.VMEM((T * B_pad, 8 * HP), jnp.float32)],   # hoisted P
        ),
        compiler_params=pltpu.CompilerParams(
            dimension_semantics=("arbitrary",),
            vmem_limit_bytes=_vmem_limit_bytes(T, B_pad, Din, HP),
        ),
    )(bs_arr, x_pad, wih, whh, bias)


# -----------------------------------------------------------------------------
# Packed <-> padded glue: single scatter / gather with precomputed indices.
# -----------------------------------------------------------------------------
def _pack_indices(batch_sizes, b_pad):
    idx = []
    for t, bs in enumerate(batch_sizes):
        idx.extend(t * b_pad + b for b in range(bs))
    return np.asarray(idx, dtype=np.int32)


def packed_to_padded(x_packed, batch_sizes, b_pad):
    T = len(batch_sizes)
    D = x_packed.shape[-1]
    idx = jnp.asarray(_pack_indices(batch_sizes, b_pad))
    flat = jnp.zeros((T * b_pad, D), x_packed.dtype).at[idx].set(x_packed)
    return flat.reshape(T, b_pad, D)


def padded_to_packed(y_pad, batch_sizes):
    T, b_pad, C = y_pad.shape
    idx = jnp.asarray(_pack_indices(batch_sizes, b_pad))
    return y_pad.reshape(T * b_pad, C)[idx]


# -----------------------------------------------------------------------------
# BiLSTM module (parameters initialized like reset_parameters: orthogonal / zeros)
# -----------------------------------------------------------------------------
class BiLSTMPallas:
    def __init__(self, input_size, hidden_size, num_layers=1, dropout=0.0, *, key):
        self.input_size = input_size
        self.hidden_size = hidden_size
        self.hidden_pad = _round_up(hidden_size, 128)     # lane-aligned gate blocks
        self.num_layers = num_layers
        self.dropout = dropout  # TODO(synk): SharedDropout only applies in training mode; eval-mode forward is exact.
        H, HP = hidden_size, self.hidden_pad
        orth = jax.nn.initializers.orthogonal()

        self.params = []
        in_sz = input_size
        for _ in range(num_layers):
            key, k1, k2, k3, k4 = jax.random.split(key, 5)
            layer = {}
            for name, kw_ih, kw_hh in (("f", k1, k2), ("b", k3, k4)):
                layer[name] = dict(
                    w_ih=orth(kw_ih, (4 * H, in_sz), jnp.float32),
                    w_hh=orth(kw_hh, (4 * H, H), jnp.float32),
                    b_ih=jnp.zeros((4 * H,), jnp.float32),
                    b_hh=jnp.zeros((4 * H,), jnp.float32),
                )
            self.params.append(layer)
            in_sz = 2 * H

        # Fused / padded weights fed to the kernel:
        #   wih[l]:  (Din_l, 8*HP) bf16 = [proj_fwd | proj_bwd], gate blocks padded to HP.
        #            For layers > 0 the input rows are scattered to the kernel's
        #            lane-padded (y_f:HP | y_b:HP) output layout.
        #   whh[l]:  (2, HP, 4*HP) bf16
        #   bias[l]: (1, 8*HP) f32 = (b_ih + b_hh) per direction, gate-padded.
        self.wih, self.whh, self.bias = [], [], []
        for li, layer in enumerate(self.params):
            din_pad = input_size if li == 0 else 2 * HP
            wih_l = np.zeros((din_pad, 8 * HP), np.float32)
            whh_l = np.zeros((2, HP, 4 * HP), np.float32)
            b_l = np.zeros((1, 8 * HP), np.float32)
            for d, name in enumerate(("f", "b")):
                p = layer[name]
                w_ih = np.asarray(p["w_ih"])              # (4H, Din_orig)
                w_hh = np.asarray(p["w_hh"])              # (4H, H)
                b = np.asarray(p["b_ih"] + p["b_hh"])     # (4H,)
                for g in range(4):
                    cols = slice(d * 4 * HP + g * HP, d * 4 * HP + g * HP + H)
                    blk = w_ih[g * H:(g + 1) * H, :].T    # (Din_orig, H)
                    if li == 0:
                        wih_l[:, cols] = blk
                    else:                                  # scatter [y_f | y_b] rows
                        wih_l[0:H, cols] = blk[0:H]
                        wih_l[HP:HP + H, cols] = blk[H:2 * H]
                    whh_l[d, 0:H, g * HP:g * HP + H] = w_hh[g * H:(g + 1) * H, :].T
                    b_l[0, cols] = b[g * H:(g + 1) * H]
            self.wih.append(jnp.asarray(wih_l, jnp.bfloat16))
            self.whh.append(jnp.asarray(whh_l, jnp.bfloat16))
            self.bias.append(jnp.asarray(b_l, jnp.float32))

    def __call__(self, x, batch_sizes, sorted_indices=None, unsorted_indices=None):
        H, HP = self.hidden_size, self.hidden_pad
        B = int(batch_sizes[0])
        B_pad = _round_up(max(B, 1), 8)
        bs_arr = jnp.asarray(np.asarray(batch_sizes, dtype=np.int32))

        x_pad = packed_to_padded(x, batch_sizes, B_pad).astype(jnp.bfloat16)
        h_n, c_n = [], []
        for l in range(self.num_layers):
            y, h_l, c_l = bilstm_layer(x_pad, bs_arr, self.wih[l], self.whh[l],
                                       self.bias[l], HP)
            x_pad = y                                  # (T, B_pad, 2*HP) bf16, already dir-concat
            h_n.append(h_l[:, :B, :H])
            c_n.append(c_l[:, :B, :H])

        # Strip the lane padding of the last layer's output and re-pack.
        y_out = jnp.concatenate(
            [x_pad[..., :H], x_pad[..., HP:HP + H]], axis=-1).astype(jnp.float32)
        data = padded_to_packed(y_out, batch_sizes)
        h = jnp.concatenate(h_n, axis=0)               # (num_layers*2, B, H)
        c = jnp.concatenate(c_n, axis=0)
        if unsorted_indices is not None:
            h = h[:, unsorted_indices]
            c = c[:, unsorted_indices]
        # (PackedSequence analog, (h_n, c_n))
        return (data, batch_sizes, sorted_indices, unsorted_indices), (h, c)


# -----------------------------------------------------------------------------
# Pure-JAX reference mirroring the kernel math (hoisted bf16 projection, f32
# gate math, bf16 y between layers) for validation of the Pallas path.
# -----------------------------------------------------------------------------
def _ref_layer(x_pad, batch_sizes, wih, whh, bias, HP):
    T, B_pad, Din = x_pad.shape
    P = (jnp.dot(x_pad.reshape(T * B_pad, Din), wih,
                 preferred_element_type=jnp.float32) + bias).reshape(T, B_pad, 8 * HP)
    row_ids = np.arange(B_pad)[:, None]

    def cell(p_gates, h, c, w_hh, active):
        gates = p_gates + jnp.dot(h.astype(jnp.bfloat16), w_hh,
                                  preferred_element_type=jnp.float32)
        i = jax.nn.sigmoid(gates[:, 0 * HP:1 * HP])
        f = jax.nn.sigmoid(gates[:, 1 * HP:2 * HP])
        g = jnp.tanh(gates[:, 2 * HP:3 * HP])
        o = jax.nn.sigmoid(gates[:, 3 * HP:4 * HP])
        c_new = f * c + i * g
        h_new = o * jnp.tanh(c_new)
        return (jnp.where(active, h_new, h), jnp.where(active, c_new, c),
                jnp.where(active, h_new, 0.0))

    z = jnp.zeros((B_pad, HP), jnp.float32)
    h_f = c_f = h_b = c_b = z
    y_f = [None] * T
    y_b = [None] * T
    for s in range(T):
        t_f, t_b = s, T - 1 - s
        h_f, c_f, y_f[t_f] = cell(P[t_f, :, :4 * HP], h_f, c_f, whh[0],
                                  row_ids < batch_sizes[t_f])
        h_b, c_b, y_b[t_b] = cell(P[t_b, :, 4 * HP:], h_b, c_b, whh[1],
                                  row_ids < batch_sizes[t_b])
    y = jnp.stack([jnp.concatenate([y_f[t], y_b[t]], axis=-1) for t in range(T)])
    return y.astype(jnp.bfloat16), jnp.stack([h_f, h_b]), jnp.stack([c_f, c_b])


def bilstm_ref(model, x_packed, batch_sizes):
    H, HP = model.hidden_size, model.hidden_pad
    B = int(batch_sizes[0])
    B_pad = _round_up(max(B, 1), 8)
    x_pad = packed_to_padded(x_packed, batch_sizes, B_pad).astype(jnp.bfloat16)
    h_n, c_n = [], []
    for l in range(model.num_layers):
        y, h_l, c_l = _ref_layer(x_pad, batch_sizes, model.wih[l], model.whh[l],
                                 model.bias[l], HP)
        x_pad = y
        h_n.append(h_l[:, :B, :H])
        c_n.append(c_l[:, :B, :H])
    y_out = jnp.concatenate(
        [x_pad[..., :H], x_pad[..., HP:HP + H]], axis=-1).astype(jnp.float32)
    return (padded_to_packed(y_out, batch_sizes),
            jnp.concatenate(h_n, 0), jnp.concatenate(c_n, 0))


if __name__ == "__main__":
    input_size, hidden_size, num_layers = 16, 32, 2
    batch_sizes = [4, 4, 3, 2, 2, 1]          # non-increasing, as in a PackedSequence
    total = sum(batch_sizes)                  # 16 packed rows

    key = jax.random.PRNGKey(0)
    key, kx, kp = jax.random.split(key, 3)
    x_packed = jax.random.normal(kx, (total, input_size), jnp.float32)

    model = BiLSTMPallas(input_size, hidden_size, num_layers, dropout=0.0, key=kp)

    (data, bsz, s_idx, u_idx), (h_n, c_n) = model(x_packed, batch_sizes, None, None)
    data = jax.block_until_ready(data)
    h_n = jax.block_until_ready(h_n)
    c_n = jax.block_until_ready(c_n)

    assert data.shape == (total, 2 * hidden_size)
    assert h_n.shape == (num_layers * 2, batch_sizes[0], hidden_size)
    assert c_n.shape == (num_layers * 2, batch_sizes[0], hidden_size)

    # Validate against the pure-JAX reference (same bf16-MXU / f32-accum math).
    data_r, h_r, c_r = bilstm_ref(model, x_packed, batch_sizes)
    np.testing.assert_allclose(np.asarray(data), np.asarray(data_r), rtol=1e-2, atol=5e-3)
    np.testing.assert_allclose(np.asarray(h_n), np.asarray(h_r), rtol=1e-2, atol=5e-3)
    np.testing.assert_allclose(np.asarray(c_n), np.asarray(c_r), rtol=1e-2, atol=5e-3)

    print("KERNEL_OK")
</pallas_src>

<mosaic_0001>
module attributes {stable_mosaic.version = 11 : i64} {
  func.func @_bilstm_layer_kernel(%arg0: i32, %arg1: memref<6xi32, #tpu.memory_space<smem>>, %arg2: memref<6x8x16xbf16, #tpu.memory_space<vmem>>, %arg3: memref<16x1024xbf16, #tpu.memory_space<vmem>>, %arg4: memref<2x128x512xbf16, #tpu.memory_space<vmem>>, %arg5: memref<1x1024xf32, #tpu.memory_space<vmem>>, %arg6: memref<6x8x256xbf16, #tpu.memory_space<vmem>>, %arg7: memref<2x8x128xf32, #tpu.memory_space<vmem>>, %arg8: memref<2x8x128xf32, #tpu.memory_space<vmem>>, %arg9: memref<48x1024xf32, #tpu.memory_space<vmem>>) attributes {dimension_semantics = [#tpu.dimension_semantics<arbitrary>], iteration_bounds = array<i64: 1>, scalar_prefetch = 1 : i64, scratch_operands = 1 : i64, tpu.core_type = #tpu.core_type<tc>, window_params = [{pipeline_mode = #tpu.pipeline_mode<synchronous>, transform_indices = @transform_0, window_bounds = array<i64: 6, 8, 16>}, {pipeline_mode = #tpu.pipeline_mode<synchronous>, transform_indices = @transform_1, window_bounds = array<i64: 16, 1024>}, {pipeline_mode = #tpu.pipeline_mode<synchronous>, transform_indices = @transform_2, window_bounds = array<i64: 2, 128, 512>}, {pipeline_mode = #tpu.pipeline_mode<synchronous>, transform_indices = @transform_3, window_bounds = array<i64: 1, 1024>}, {pipeline_mode = #tpu.pipeline_mode<synchronous>, transform_indices = @transform_4, window_bounds = array<i64: 6, 8, 256>}, {pipeline_mode = #tpu.pipeline_mode<synchronous>, transform_indices = @transform_5, window_bounds = array<i64: 2, 8, 128>}, {pipeline_mode = #tpu.pipeline_mode<synchronous>, transform_indices = @transform_6, window_bounds = array<i64: 2, 8, 128>}]} {
    %c0 = arith.constant 0 : index
    %c0_0 = arith.constant 0 : index
    %c0_1 = arith.constant 0 : index
    %0 = vector.load %arg2[%c0, %c0_0, %c0_1] : memref<6x8x16xbf16, #tpu.memory_space<vmem>>, vector<6x8x16xbf16>
    %1 = vector.shape_cast %0 : vector<6x8x16xbf16> to vector<48x16xbf16>
    %c0_2 = arith.constant 0 : index
    %c0_3 = arith.constant 0 : index
    %2 = vector.load %arg3[%c0_2, %c0_3] : memref<16x1024xbf16, #tpu.memory_space<vmem>>, vector<16x1024xbf16>
    %cst = arith.constant dense<0.000000e+00> : vector<48x1024xf32>
    %3 = tpu.matmul %1, %2, %cst {dimension_numbers = #tpu.dot_dimension_numbers<[1], [0], [0], [1], [0, 0, 1, 1], [], []>} : vector<48x16xbf16>, vector<16x1024xbf16>, vector<48x1024xf32> -> vector<48x1024xf32>
    %c0_4 = arith.constant 0 : index
    %c0_5 = arith.constant 0 : index
    %4 = vector.load %arg5[%c0_4, %c0_5] : memref<1x1024xf32, #tpu.memory_space<vmem>>, vector<1x1024xf32>
    %5 = vector.broadcast %4 : vector<1x1024xf32> to vector<48x1024xf32>
    %6 = arith.addf %3, %5 : vector<48x1024xf32>
    %c0_6 = arith.constant 0 : index
    %c0_7 = arith.constant 0 : index
    %7 = vector.load %arg9[%c0_6, %c0_7] : memref<48x1024xf32, #tpu.memory_space<vmem>>, vector<48x1024xf32>
    tpu.vector_store %arg9[%c0_6, %c0_7], %6 {strides = array<i32>} : memref<48x1024xf32, #tpu.memory_space<vmem>>, vector<48x1024xf32>,
    %c0_8 = arith.constant 0 : index
    %c0_9 = arith.constant 0 : index
    %c0_10 = arith.constant 0 : index
    %8 = vector.load %arg4[%c0_8, %c0_9, %c0_10] : memref<2x128x512xbf16, #tpu.memory_space<vmem>>, vector<1x128x512xbf16>
    %9 = vector.shape_cast %8 : vector<1x128x512xbf16> to vector<128x512xbf16>
    %c1 = arith.constant 1 : index
    %c0_11 = arith.constant 0 : index
    %c0_12 = arith.constant 0 : index
    %10 = vector.load %arg4[%c1, %c0_11, %c0_12] : memref<2x128x512xbf16, #tpu.memory_space<vmem>>, vector<1x128x512xbf16>
    %11 = vector.shape_cast %10 : vector<1x128x512xbf16> to vector<128x512xbf16>
    %12 = tpu.iota {dimensions = array<i32: 0>} : vector<8x1xi32>
    %cst_13 = arith.constant 0.000000e+00 : f32
    %13 = vector.broadcast %cst_13 : f32 to vector<8x128xf32>
    %c0_i32 = arith.constant 0 : i32
    %c6_i32 = arith.constant 6 : i32
    %14 = arith.addi %c0_i32, %c6_i32 : i32
    %c1_i32 = arith.constant 1 : i32
    %15:4 = scf.for %arg10 = %c0_i32 to %14 step %c1_i32 iter_args(%arg11 = %13, %arg12 = %13, %arg13 = %13, %arg14 = %13) -> (vector<8x128xf32>, vector<8x128xf32>, vector<8x128xf32>, vector<8x128xf32>)  : i32 {
      %c5_i32 = arith.constant 5 : i32
      %28 = arith.subi %c5_i32, %arg10 : i32
      %c8_i32 = arith.constant 8 : i32
      %29 = arith.muli %arg10, %c8_i32 : i32
      %30 = tpu.assume_multiple %29, 8 : i32
      %c8_i32_27 = arith.constant 8 : i32
      %31 = arith.muli %28, %c8_i32_27 : i32
      %32 = tpu.assume_multiple %31, 8 : i32
      %33 = arith.index_cast %30 : i32 to index
      %c0_28 = arith.constant 0 : index
      %34 = vector.load %arg9[%33, %c0_28] : memref<48x1024xf32, #tpu.memory_space<vmem>>, vector<8x512xf32>
      %35 = arith.index_cast %32 : i32 to index
      %c512 = arith.constant 512 : index
      %36 = vector.load %arg9[%35, %c512] : memref<48x1024xf32, #tpu.memory_space<vmem>>, vector<8x512xf32>
      %37 = arith.index_cast %arg10 : i32 to index
      %38 = memref.load %arg1[%37] : memref<6xi32, #tpu.memory_space<smem>>
      %39 = vector.broadcast %38 : i32 to vector<8x1xi32>
      %40 = arith.cmpi slt, %12, %39 : vector<8x1xi32>
      %41 = arith.index_cast %28 : i32 to index
      %42 = memref.load %arg1[%41] : memref<6xi32, #tpu.memory_space<smem>>
      %43 = vector.broadcast %42 : i32 to vector<8x1xi32>
      %44 = arith.cmpi slt, %12, %43 : vector<8x1xi32>
      %45 = arith.truncf %arg11 : vector<8x128xf32> to vector<8x128xbf16>
      %cst_29 = arith.constant dense<0.000000e+00> : vector<8x512xf32>
      %46 = tpu.matmul %45, %9, %cst_29 {dimension_numbers = #tpu.dot_dimension_numbers<[1], [0], [0], [1], [0, 0, 1, 1], [], []>} : vector<8x128xbf16>, vector<128x512xbf16>, vector<8x512xf32> -> vector<8x512xf32>
      %47 = arith.addf %34, %46 : vector<8x512xf32>
      %48 = vector.extract_strided_slice %47 {offsets = [0, 0], sizes = [8, 128], strides = [1, 1]} : vector<8x512xf32> to vector<8x128xf32>
      %49 = arith.negf %48 : vector<8x128xf32>
      %50 = math.exp %49 : vector<8x128xf32>
      %cst_30 = arith.constant 1.000000e+00 : f32
      %51 = vector.broadcast %cst_30 : f32 to vector<8x128xf32>
      %52 = arith.addf %51, %50 : vector<8x128xf32>
      %53 = arith.divf %51, %52 : vector<8x128xf32>
      %54 = vector.extract_strided_slice %47 {offsets = [0, 128], sizes = [8, 128], strides = [1, 1]} : vector<8x512xf32> to vector<8x128xf32>
      %55 = arith.negf %54 : vector<8x128xf32>
      %56 = math.exp %55 : vector<8x128xf32>
      %cst_31 = arith.constant 1.000000e+00 : f32
      %57 = vector.broadcast %cst_31 : f32 to vector<8x128xf32>
      %58 = arith.addf %57, %56 : vector<8x128xf32>
      %59 = arith.divf %57, %58 : vector<8x128xf32>
      %60 = vector.extract_strided_slice %47 {offsets = [0, 256], sizes = [8, 128], strides = [1, 1]} : vector<8x512xf32> to vector<8x128xf32>
      %61 = math.tanh %60 : vector<8x128xf32>
      %62 = vector.extract_strided_slice %47 {offsets = [0, 384], sizes = [8, 128], strides = [1, 1]} : vector<8x512xf32> to vector<8x128xf32>
      %63 = arith.negf %62 : vector<8x128xf32>
      %64 = math.exp %63 : vector<8x128xf32>
      %cst_32 = arith.constant 1.000000e+00 : f32
      %65 = vector.broadcast %cst_32 : f32 to vector<8x128xf32>
      %66 = arith.addf %65, %64 : vector<8x128xf32>
      %67 = arith.divf %65, %66 : vector<8x128xf32>
      %68 = arith.mulf %59, %arg12 : vector<8x128xf32>
      %69 = arith.mulf %53, %61 : vector<8x128xf32>
      %70 = arith.addf %68, %69 : vector<8x128xf32>
      %71 = math.tanh %70 : vector<8x128xf32>
      %72 = arith.mulf %67, %71 : vector<8x128xf32>
      %73 = vector.shape_cast %40 : vector<8x1xi1> to vector<8x1xi1>
      %74 = vector.broadcast %73 : vector<8x1xi1> to vector<8x128xi1>
      %75 = arith.select %74, %72, %arg11 : vector<8x128xi1>, vector<8x128xf32>
      %76 = vector.shape_cast %40 : vector<8x1xi1> to vector<8x1xi1>
      %77 = vector.broadcast %76 : vector<8x1xi1> to vector<8x128xi1>
      %78 = arith.select %77, %70, %arg12 : vector<8x128xi1>, vector<8x128xf32>
      %cst_33 = arith.constant 0.000000e+00 : f32
      %79 = vector.shape_cast %40 : vector<8x1xi1> to vector<8x1xi1>
      %80 = vector.broadcast %79 : vector<8x1xi1> to vector<8x128xi1>
      %81 = vector.broadcast %cst_33 : f32 to vector<8x128xf32>
      %82 = arith.select %80, %72, %81 : vector<8x128xi1>, vector<8x128xf32>
      %83 = arith.truncf %arg13 : vector<8x128xf32> to vector<8x128xbf16>
      %cst_34 = arith.constant dense<0.000000e+00> : vector<8x512xf32>
      %84 = tpu.matmul %83, %11, %cst_34 {dimension_numbers = #tpu.dot_dimension_numbers<[1], [0], [0], [1], [0, 0, 1, 1], [], []>} : vector<8x128xbf16>, vector<128x512xbf16>, vector<8x512xf32> -> vector<8x512xf32>
      %85 = arith.addf %36, %84 : vector<8x512xf32>
      %86 = vector.extract_strided_slice %85 {offsets = [0, 0], sizes = [8, 128], strides = [1, 1]} : vector<8x512xf32> to vector<8x128xf32>
      %87 = arith.negf %86 : vector<8x128xf32>
      %88 = math.exp %87 : vector<8x128xf32>
      %cst_35 = arith.constant 1.000000e+00 : f32
      %89 = vector.broadcast %cst_35 : f32 to vector<8x128xf32>
      %90 = arith.addf %89, %88 : vector<8x128xf32>
      %91 = arith.divf %89, %90 : vector<8x128xf32>
      %92 = vector.extract_strided_slice %85 {offsets = [0, 128], sizes = [8, 128], strides = [1, 1]} : vector<8x512xf32> to vector<8x128xf32>
      %93 = arith.negf %92 : vector<8x128xf32>
      %94 = math.exp %93 : vector<8x128xf32>
      %cst_36 = arith.constant 1.000000e+00 : f32
      %95 = vector.broadcast %cst_36 : f32 to vector<8x128xf32>
      %96 = arith.addf %95, %94 : vector<8x128xf32>
      %97 = arith.divf %95, %96 : vector<8x128xf32>
      %98 = vector.extract_strided_slice %85 {offsets = [0, 256], sizes = [8, 128], strides = [1, 1]} : vector<8x512xf32> to vector<8x128xf32>
      %99 = math.tanh %98 : vector<8x128xf32>
      %100 = vector.extract_strided_slice %85 {offsets = [0, 384], sizes = [8, 128], strides = [1, 1]} : vector<8x512xf32> to vector<8x128xf32>
      %101 = arith.negf %100 : vector<8x128xf32>
      %102 = math.exp %101 : vector<8x128xf32>
      %cst_37 = arith.constant 1.000000e+00 : f32
      %103 = vector.broadcast %cst_37 : f32 to vector<8x128xf32>
      %104 = arith.addf %103, %102 : vector<8x128xf32>
      %105 = arith.divf %103, %104 : vector<8x128xf32>
      %106 = arith.mulf %97, %arg14 : vector<8x128xf32>
      %107 = arith.mulf %91, %99 : vector<8x128xf32>
      %108 = arith.addf %106, %107 : vector<8x128xf32>
      %109 = math.tanh %108 : vector<8x128xf32>
      %110 = arith.mulf %105, %109 : vector<8x128xf32>
      %111 = vector.shape_cast %44 : vector<8x1xi1> to vector<8x1xi1>
      %112 = vector.broadcast %111 : vector<8x1xi1> to vector<8x128xi1>
      %113 = arith.select %112, %110, %arg13 : vector<8x128xi1>, vector<8x128xf32>
      %114 = vector.shape_cast %44 : vector<8x1xi1> to vector<8x1xi1>
      %115 = vector.broadcast %114 : vector<8x1xi1> to vector<8x128xi1>
      %116 = arith.select %115, %108, %arg14 : vector<8x128xi1>, vector<8x128xf32>
      %cst_38 = arith.constant 0.000000e+00 : f32
      %117 = vector.shape_cast %44 : vector<8x1xi1> to vector<8x1xi1>
      %118 = vector.broadcast %117 : vector<8x1xi1> to vector<8x128xi1>
      %119 = vector.broadcast %cst_38 : f32 to vector<8x128xf32>
      %120 = arith.select %118, %110, %119 : vector<8x128xi1>, vector<8x128xf32>
      %121 = arith.truncf %82 : vector<8x128xf32> to vector<8x128xbf16>
      %122 = arith.index_cast %arg10 : i32 to index
      %c0_39 = arith.constant 0 : index
      %c0_40 = arith.constant 0 : index
      %123 = vector.load %arg6[%122, %c0_39, %c0_40] : memref<6x8x256xbf16, #tpu.memory_space<vmem>>, vector<1x8x128xbf16>
      %124 = vector.shape_cast %123 : vector<1x8x128xbf16> to vector<8x128xbf16>
      %125 = vector.shape_cast %121 : vector<8x128xbf16> to vector<1x8x128xbf16>
      tpu.vector_store %arg6[%122, %c0_39, %c0_40], %125 {strides = array<i32>} : memref<6x8x256xbf16, #tpu.memory_space<vmem>>, vector<1x8x128xbf16>,
      %126 = arith.truncf %120 : vector<8x128xf32> to vector<8x128xbf16>
      %127 = arith.index_cast %28 : i32 to index
      %c0_41 = arith.constant 0 : index
      %c128 = arith.constant 128 : index
      %128 = vector.load %arg6[%127, %c0_41, %c128] : memref<6x8x256xbf16, #tpu.memory_space<vmem>>, vector<1x8x128xbf16>
      %129 = vector.shape_cast %128 : vector<1x8x128xbf16> to vector<8x128xbf16>
      %130 = vector.shape_cast %126 : vector<8x128xbf16> to vector<1x8x128xbf16>
      tpu.vector_store %arg6[%127, %c0_41, %c128], %130 {strides = array<i32>} : memref<6x8x256xbf16, #tpu.memory_space<vmem>>, vector<1x8x128xbf16>,
      scf.yield %75, %78, %113, %116 : vector<8x128xf32>, vector<8x128xf32>, vector<8x128xf32>, vector<8x128xf32>
    }
    %c6_i32_14 = arith.constant 6 : i32
    %c0_15 = arith.constant 0 : index
    %c0_16 = arith.constant 0 : index
    %c0_17 = arith.constant 0 : index
    %16 = vector.load %arg7[%c0_15, %c0_16, %c0_17] : memref<2x8x128xf32, #tpu.memory_space<vmem>>, vector<1x8x128xf32>
    %17 = vector.shape_cast %16 : vector<1x8x128xf32> to vector<8x128xf32>
    %18 = vector.shape_cast %15#0 : vector<8x128xf32> to vector<1x8x128xf32>
    tpu.vector_store %arg7[%c0_15, %c0_16, %c0_17], %18 {strides = array<i32>} : memref<2x8x128xf32, #tpu.memory_space<vmem>>, vector<1x8x128xf32>,
    %c1_18 = arith.constant 1 : index
    %c0_19 = arith.constant 0 : index
    %c0_20 = arith.constant 0 : index
    %19 = vector.load %arg7[%c1_18, %c0_19, %c0_20] : memref<2x8x128xf32, #tpu.memory_space<vmem>>, vector<1x8x128xf32>
    %20 = vector.shape_cast %19 : vector<1x8x128xf32> to vector<8x128xf32>
    %21 = vector.shape_cast %15#2 : vector<8x128xf32> to vector<1x8x128xf32>
    tpu.vector_store %arg7[%c1_18, %c0_19, %c0_20], %21 {strides = array<i32>} : memref<2x8x128xf32, #tpu.memory_space<vmem>>, vector<1x8x128xf32>,
    %c0_21 = arith.constant 0 : index
    %c0_22 = arith.constant 0 : index
    %c0_23 = arith.constant 0 : index
    %22 = vector.load %arg8[%c0_21, %c0_22, %c0_23] : memref<2x8x128xf32, #tpu.memory_space<vmem>>, vector<1x8x128xf32>
    %23 = vector.shape_cast %22 : vector<1x8x128xf32> to vector<8x128xf32>
    %24 = vector.shape_cast %15#1 : vector<8x128xf32> to vector<1x8x128xf32>
    tpu.vector_store %arg8[%c0_21, %c0_22, %c0_23], %24 {strides = array<i32>} : memref<2x8x128xf32, #tpu.memory_space<vmem>>, vector<1x8x128xf32>,
    %c1_24 = arith.constant 1 : index
    %c0_25 = arith.constant 0 : index
    %c0_26 = arith.constant 0 : index
    %25 = vector.load %arg8[%c1_24, %c0_25, %c0_26] : memref<2x8x128xf32, #tpu.memory_space<vmem>>, vector<1x8x128xf32>
    %26 = vector.shape_cast %25 : vector<1x8x128xf32> to vector<8x128xf32>
    %27 = vector.shape_cast %15#3 : vector<8x128xf32> to vector<1x8x128xf32>
    tpu.vector_store %arg8[%c1_24, %c0_25, %c0_26], %27 {strides = array<i32>} : memref<2x8x128xf32, #tpu.memory_space<vmem>>, vector<1x8x128xf32>,
    return
  }
  func.func @transform_0(%arg0: i32, %arg1: memref<6xi32, #tpu.memory_space<smem>>) -> (i32, i32, i32) {
    %c0_i32 = arith.constant 0 : i32
    %c0_i32_0 = arith.constant 0 : i32
    %c0_i32_1 = arith.constant 0 : i32
    %c0_i32_2 = arith.constant 0 : i32
    return %c0_i32, %c0_i32_0, %c0_i32_1 : i32, i32, i32
  }
  func.func @transform_1(%arg0: i32, %arg1: memref<6xi32, #tpu.memory_space<smem>>) -> (i32, i32) {
    %c0_i32 = arith.constant 0 : i32
    %c0_i32_0 = arith.constant 0 : i32
    %c0_i32_1 = arith.constant 0 : i32
    return %c0_i32, %c0_i32_0 : i32, i32
  }
  func.func @transform_2(%arg0: i32, %arg1: memref<6xi32, #tpu.memory_space<smem>>) -> (i32, i32, i32) {
    %c0_i32 = arith.constant 0 : i32
    %c0_i32_0 = arith.constant 0 : i32
    %c0_i32_1 = arith.constant 0 : i32
    %c0_i32_2 = arith.constant 0 : i32
    return %c0_i32, %c0_i32_0, %c0_i32_1 : i32, i32, i32
  }
  func.func @transform_3(%arg0: i32, %arg1: memref<6xi32, #tpu.memory_space<smem>>) -> (i32, i32) {
    %c0_i32 = arith.constant 0 : i32
    %c0_i32_0 = arith.constant 0 : i32
    %c0_i32_1 = arith.constant 0 : i32
    return %c0_i32, %c0_i32_0 : i32, i32
  }
  func.func @transform_4(%arg0: i32, %arg1: memref<6xi32, #tpu.memory_space<smem>>) -> (i32, i32, i32) {
    %c0_i32 = arith.constant 0 : i32
    %c0_i32_0 = arith.constant 0 : i32
    %c0_i32_1 = arith.constant 0 : i32
    %c0_i32_2 = arith.constant 0 : i32
    return %c0_i32, %c0_i32_0, %c0_i32_1 : i32, i32, i32
  }
  func.func @transform_5(%arg0: i32, %arg1: memref<6xi32, #tpu.memory_space<smem>>) -> (i32, i32, i32) {
    %c0_i32 = arith.constant 0 : i32
    %c0_i32_0 = arith.constant 0 : i32
    %c0_i32_1 = arith.constant 0 : i32
    %c0_i32_2 = arith.constant 0 : i32
    return %c0_i32, %c0_i32_0, %c0_i32_1 : i32, i32, i32
  }
  func.func @transform_6(%arg0: i32, %arg1: memref<6xi32, #tpu.memory_space<smem>>) -> (i32, i32, i32) {
    %c0_i32 = arith.constant 0 : i32
    %c0_i32_0 = arith.constant 0 : i32
    %c0_i32_1 = arith.constant 0 : i32
    %c0_i32_2 = arith.constant 0 : i32
    return %c0_i32, %c0_i32_0, %c0_i32_1 : i32, i32, i32
  }
}

</mosaic_0001>

<bundles_post_ra>
// kernel: tpu_custom_call.1
= control target key start
LH: loop header
LB: loop body
LE: loop exit
PB: predicated region body
PF: predicated region fallthrough
CT: control target
= control target key end

     0   :  { %s1940_s27 = smov [#allocation4]   ;;  %s2634_s0 = inlined_call_operand.hbm [shape: s32[6], index: 0, kind: input, shape index: {}]   ;;  %s2635_s1 = inlined_call_operand.hbm [shape: bf16[6,8,16], index: 1, kind: input, shape index: {}]   ;;  %s2636_s2 = inlined_call_operand.hbm [shape: bf16[16,1024], index: 2, kind: input, shape index: {}]   ;;  %s2637_s3 = inlined_call_operand.hbm [shape: bf16[2,128,512], index: 3, kind: input, shape index: {}]   ;;  %s2638_s4 = inlined_call_operand.hbm [shape: f32[1,1024], index: 4, kind: input, shape index: {}]   ;;  %s2639_s5 = inlined_call_operand.hbm [shape: bf16[6,8,256], index: 5, kind: output, shape index: {0}]   ;;  %s2640_s6 = inlined_call_operand.hbm [shape: f32[2,8,128], index: 6, kind: output, shape index: {1}]   ;;  %s2641_s7 = inlined_call_operand.hbm [shape: f32[2,8,128], index: 7, kind: output, shape index: {2}]  }
   0x1   :  { %s14_s26 = sshll.u32 %s2634_s0, 4  ;;  %s15_s26 = int_to_ptr.hbm [resolvable:$true] %s14_s26 }
   0x2   :  { %17 = dma.hbm_to_smem %s15_s26, 16, %s1940_s27, [#allocation3] }
   0x3   :  { %1908 = dma.done.wait [#allocation3], 16 }
   0x4   :  { %1909 = vsyncadd [#allocation3], 4294967280 }
   0x5   :  { %20 = sfence }
   0x6   :  { %21 = vsyncpa [#allocation6], 0 }
   0x7   :  { %22 = vsyncpa [#allocation9], 0 }
   0x8   :  { %23 = vsyncpa [#allocation12], 0 }
   0x9   :  { %24 = vsyncpa [#allocation7], 0  ;;  %s43_s30 = sshll.u32 %s2636_s2, 4  ;;  %s44_s30 = int_to_ptr.hbm [resolvable:$true] %s43_s30 }
   0xa   :  { %25 = vsyncpa [#allocation15], 0  ;;  %s1941_s8 = smov [#allocation8]   ;;  %s30_s11 = sshll.u32 %s2635_s1, 4  ;;  %s31_s11 = int_to_ptr.hbm [resolvable:$true] %s30_s11 }
   0xb   :  { %s45_s9 = sshll.u32 %s1941_s8, 4  ;;  %s1942_s12 = smov 512   ;;  %s46_s9 = int_to_ptr.vmem [resolvable:$true] %s45_s9 }
   0xc   :  { %s1943_s13 = smov 32   ;;  %s1944_s14 = smov [#allocation5]  }
   0xd   :  { %51 = dma.hbm_to_vmem [thread:$0]  %s44_s30, 1024, %s46_s9, [#allocation9], %s1942_s12, %s1942_s12, %s1943_s13  }
   0xe   :  { %s32_s15 = sshll.u32 %s1944_s14, 4  ;;  %s1945_s16 = smov 64   ;;  %s33_s15 = int_to_ptr.vmem [resolvable:$true] %s32_s15 }
   0xf   :  { %s1946_s17 = smov 4   ;;  %s56_s19 = sshll.u32 %s2637_s3, 4  ;;  %s57_s19 = int_to_ptr.hbm [resolvable:$true] %s56_s19 }
  0x10   :  { %38 = dma.hbm_to_vmem [thread:$0]  %s31_s11, 384, %s33_s15, [#allocation6], %s1945_s16, %s1945_s16, %s1946_s17  }
  0x11   :  { %s1947_s20 = smov [#allocation10]   ;;  %s70_s23 = sshll.u32 %s2638_s4, 4  ;;  %s71_s23 = int_to_ptr.hbm [resolvable:$true] %s70_s23 }
  0x12   :  { %s58_s21 = sshll.u32 %s1947_s20, 4  ;;  %s1948_s24 = smov 256   ;;  %s59_s21 = int_to_ptr.vmem [resolvable:$true] %s58_s21 }
  0x13   :  { %s1949_s25 = smov 16   ;;  %s1950_s26 = smov [#allocation11]  }
  0x14   :  { %64 = dma.hbm_to_vmem [thread:$0]  %s57_s19, 8192, %s59_s21, [#allocation9], %s1948_s24, %s1948_s24, %s1949_s25  }
  0x15   :  { %s72_s27 = sshll.u32 %s1950_s26, 4  ;;  %s73_s27 = int_to_ptr.vmem [resolvable:$true] %s72_s27 }
  0x16   :  { %75 = dma.hbm_to_vmem [thread:$0]  %s71_s23, 128, %s73_s27, [#allocation12]  }
  0x17   :  { %1910 = dma.done.wait [#allocation6], 384  }
  0x18   :  { %1911 = vsyncadd [#allocation6], 4294966912 }
  0x19   :  { %1912 = dma.done.wait [#allocation9], 9216  }
  0x1a   :  { %1913 = vsyncadd [#allocation9], 4294958080 }
  0x1b   :  { %1914 = dma.done.wait [#allocation12], 128  }
  0x1c   :  { %1915 = vsyncadd [#allocation12], 4294967168  ;;  %v2011_v0 = vld [vmem:[#allocation10 + $0x4] sm:$0xf]  ;;  %v2013_v1 = vld [vmem:[#allocation10] sm:$0xf] }
  0x1d   :  { %2642 = vst [vmem:[#allocation23_spill] sm:$0xff] %v2011_v0  ;;  %v2015_v2 = vld [vmem:[#allocation10 + $0xc] sm:$0xf]  ;;  %v2017_v3 = vld [vmem:[#allocation10 + $0x8] sm:$0xf]  ;;  %vm180_vm0 = vcmask 130048  }
  0x1e   :  { %2643 = vst [vmem:[#allocation24_spill] sm:$0xff] %v2013_v1  ;;  %v2019_v4 = vld [vmem:[#allocation10 + $0x10] sm:$0xf0]  ;;  %v2021_v5 = vld [vmem:[#allocation10 + $0xc] sm:$0xf0]  ;;  %s2375_s3 = smov 0  }
  0x1f   :  { %2644 = vst [vmem:[#allocation25_spill] sm:$0xff] %v2015_v2  ;;  %v2023_v6 = vld [vmem:[#allocation10 + $0x18] sm:$0xf0]  ;;  %v2025_v7 = vld [vmem:[#allocation10 + $0x14] sm:$0xf0] }
  0x20   :  { %2645 = vst [vmem:[#allocation26_spill] sm:$0xff] %v2017_v3  ;;  %v2027_v8 = vld [vmem:[#allocation10 + $0x24] sm:$0xf]  ;;  %v2029_v9 = vld [vmem:[#allocation10 + $0x20] sm:$0xf] }
  0x21   :  { %2646 = vst [vmem:[#allocation27_spill] sm:$0xff] %v2019_v4  ;;  %v2031_v10 = vld [vmem:[#allocation10 + $0x2c] sm:$0xf]  ;;  %v2033_v11 = vld [vmem:[#allocation10 + $0x28] sm:$0xf] }
  0x22   :  { %2647 = vst [vmem:[#allocation28_spill] sm:$0xff] %v2021_v5  ;;  %v2035_v12 = vld [vmem:[#allocation10 + $0x30] sm:$0xf0]  ;;  %v2037_v13 = vld [vmem:[#allocation10 + $0x2c] sm:$0xf0] }
  0x23   :  { %2648 = vst [vmem:[#allocation29_spill] sm:$0xff] %v2023_v6  ;;  %v2039_v14 = vld [vmem:[#allocation10 + $0x38] sm:$0xf0]  ;;  %v2041_v15 = vld [vmem:[#allocation10 + $0x34] sm:$0xf0] }
  0x24   :  { %2649 = vst [vmem:[#allocation30_spill] sm:$0xff] %v2025_v7  ;;  %v2043_v16 = vld [vmem:[#allocation10 + $0x44] sm:$0xf]  ;;  %v2045_v17 = vld [vmem:[#allocation10 + $0x40] sm:$0xf] }
  0x25   :  { %2650 = vst [vmem:[#allocation31_spill] sm:$0xff] %v2027_v8  ;;  %v2047_v18 = vld [vmem:[#allocation10 + $0x4c] sm:$0xf]  ;;  %v2049_v19 = vld [vmem:[#allocation10 + $0x48] sm:$0xf] }
  0x26   :  { %2651 = vst [vmem:[#allocation32_spill] sm:$0xff] %v2029_v9  ;;  %v2051_v20 = vld [vmem:[#allocation10 + $0x50] sm:$0xf0]  ;;  %v2053_v21 = vld [vmem:[#allocation10 + $0x4c] sm:$0xf0] }
  0x27   :  { %2652 = vst [vmem:[#allocation33_spill] sm:$0xff] %v2031_v10  ;;  %v2055_v22 = vld [vmem:[#allocation10 + $0x58] sm:$0xf0]  ;;  %v2057_v23 = vld [vmem:[#allocation10 + $0x54] sm:$0xf0] }
  0x28   :  { %2653 = vst [vmem:[#allocation34_spill] sm:$0xff] %v2033_v11  ;;  %v2059_v24 = vld [vmem:[#allocation10 + $0x64] sm:$0xf]  ;;  %v2061_v25 = vld [vmem:[#allocation10 + $0x60] sm:$0xf] }
  0x29   :  { %2654 = vst [vmem:[#allocation35_spill] sm:$0xff] %v2035_v12  ;;  %v2063_v26 = vld [vmem:[#allocation10 + $0x6c] sm:$0xf]  ;;  %v2065_v27 = vld [vmem:[#allocation10 + $0x68] sm:$0xf] }
  0x2a   :  { %2655 = vst [vmem:[#allocation36_spill] sm:$0xff] %v2037_v13  ;;  %v2067_v28 = vld [vmem:[#allocation10 + $0x70] sm:$0xf0]  ;;  %v2069_v29 = vld [vmem:[#allocation10 + $0x6c] sm:$0xf0] }
  0x2b   :  { %2656 = vst [vmem:[#allocation37_spill] sm:$0xff] %v2039_v14  ;;  %v2071_v30 = vld [vmem:[#allocation10 + $0x78] sm:$0xf0]  ;;  %v2073_v31 = vld [vmem:[#allocation10 + $0x74] sm:$0xf0] }
  0x2c   :  { %2657 = vst [vmem:[#allocation38_spill] sm:$0xff] %v2041_v15  ;;  %v2075_v32 = vld [vmem:[#allocation10 + $0x84] sm:$0xf]  ;;  %v2077_v33 = vld [vmem:[#allocation10 + $0x80] sm:$0xf] }
  0x2d   :  { %2658 = vst [vmem:[#allocation39_spill] sm:$0xff] %v2043_v16  ;;  %v2079_v34 = vld [vmem:[#allocation10 + $0x8c] sm:$0xf]  ;;  %v2081_v35 = vld [vmem:[#allocation10 + $0x88] sm:$0xf] }
  0x2e   :  { %2659 = vst [vmem:[#allocation40_spill] sm:$0xff] %v2045_v17  ;;  %v2083_v36 = vld [vmem:[#allocation10 + $0x90] sm:$0xf0]  ;;  %v2085_v37 = vld [vmem:[#allocation10 + $0x8c] sm:$0xf0] }
  0x2f   :  { %2660 = vst [vmem:[#allocation41_spill] sm:$0xff] %v2047_v18  ;;  %v2087_v38 = vld [vmem:[#allocation10 + $0x98] sm:$0xf0]  ;;  %v2089_v39 = vld [vmem:[#allocation10 + $0x94] sm:$0xf0] }
  0x30   :  { %2661 = vst [vmem:[#allocation42_spill] sm:$0xff] %v2049_v19  ;;  %v2091_v40 = vld [vmem:[#allocation10 + $0xa4] sm:$0xf]  ;;  %v2093_v41 = vld [vmem:[#allocation10 + $0xa0] sm:$0xf] }
  0x31   :  { %2662 = vst [vmem:[#allocation43_spill] sm:$0xff] %v2051_v20  ;;  %v2095_v42 = vld [vmem:[#allocation10 + $0xac] sm:$0xf]  ;;  %v2097_v43 = vld [vmem:[#allocation10 + $0xa8] sm:$0xf] }
  0x32   :  { %2663 = vst [vmem:[#allocation44_spill] sm:$0xff] %v2053_v21  ;;  %v2099_v44 = vld [vmem:[#allocation10 + $0xb0] sm:$0xf0]  ;;  %v2101_v45 = vld [vmem:[#allocation10 + $0xac] sm:$0xf0] }
  0x33   :  { %2664 = vst [vmem:[#allocation45_spill] sm:$0xff] %v2055_v22  ;;  %v2103_v46 = vld [vmem:[#allocation10 + $0xb8] sm:$0xf0]  ;;  %v2105_v47 = vld [vmem:[#allocation10 + $0xb4] sm:$0xf0] }
  0x34   :  { %2665 = vst [vmem:[#allocation46_spill] sm:$0xff] %v2057_v23  ;;  %v2107_v48 = vld [vmem:[#allocation10 + $0xc4] sm:$0xf]  ;;  %v2109_v49 = vld [vmem:[#allocation10 + $0xc0] sm:$0xf] }
  0x35   :  { %2666 = vst [vmem:[#allocation47_spill] sm:$0xff] %v2059_v24  ;;  %v2111_v50 = vld [vmem:[#allocation10 + $0xcc] sm:$0xf]  ;;  %v2113_v51 = vld [vmem:[#allocation10 + $0xc8] sm:$0xf] }
  0x36   :  { %2667 = vst [vmem:[#allocation48_spill] sm:$0xff] %v2061_v25  ;;  %v2115_v52 = vld [vmem:[#allocation10 + $0xd0] sm:$0xf0]  ;;  %v2117_v53 = vld [vmem:[#allocation10 + $0xcc] sm:$0xf0] }
  0x37   :  { %2668 = vst [vmem:[#allocation49_spill] sm:$0xff] %v2063_v26  ;;  %v2119_v54 = vld [vmem:[#allocation10 + $0xd8] sm:$0xf0]  ;;  %v2121_v55 = vld [vmem:[#allocation10 + $0xd4] sm:$0xf0] }
  0x38   :  { %2669 = vst [vmem:[#allocation50_spill] sm:$0xff] %v2065_v27  ;;  %v2123_v56 = vld [vmem:[#allocation10 + $0xe4] sm:$0xf]  ;;  %v2125_v57 = vld [vmem:[#allocation10 + $0xe0] sm:$0xf] }
  0x39   :  { %2670 = vst [vmem:[#allocation51_spill] sm:$0xff] %v2067_v28  ;;  %v2127_v58 = vld [vmem:[#allocation10 + $0xec] sm:$0xf]  ;;  %v2129_v59 = vld [vmem:[#allocation10 + $0xe8] sm:$0xf] }
  0x3a   :  { %2671 = vst [vmem:[#allocation52_spill] sm:$0xff] %v2069_v29  ;;  %v2131_v60 = vld [vmem:[#allocation10 + $0xf0] sm:$0xf0]  ;;  %v2133_v61 = vld [vmem:[#allocation10 + $0xec] sm:$0xf0] }
  0x3b   :  { %2672 = vst [vmem:[#allocation53_spill] sm:$0xff] %v2071_v30  ;;  %v2135_v62 = vld [vmem:[#allocation10 + $0xf8] sm:$0xf0]  ;;  %v2137_v63 = vld [vmem:[#allocation10 + $0xf4] sm:$0xf0] }
  0x3c   :  { %2673 = vst [vmem:[#allocation54_spill] sm:$0xff] %v2073_v31  ;;  %v2139_v7 = vld [vmem:[#allocation10 + $0x104] sm:$0xf]  ;;  %v2141_v3 = vld [vmem:[#allocation10 + $0x100] sm:$0xf] }
  0x3d   :  { %2674 = vst [vmem:[#allocation55_spill] sm:$0xff] %v2075_v32  ;;  %v2143_v2 = vld [vmem:[#allocation10 + $0x10c] sm:$0xf]  ;;  %v2145_v6 = vld [vmem:[#allocation10 + $0x108] sm:$0xf] }
  0x3e   :  { %2675 = vst [vmem:[#allocation56_spill] sm:$0xff] %v2139_v7  ;;  %v2147_v0 = vld [vmem:[#allocation10 + $0x110] sm:$0xf0]  ;;  %v2149_v4 = vld [vmem:[#allocation10 + $0x10c] sm:$0xf0] }
  0x3f   :  { %2676 = vst [vmem:[#allocation57_spill] sm:$0xff] %v2141_v3  ;;  %v2151_v5 = vld [vmem:[#allocation10 + $0x118] sm:$0xf0]  ;;  %v2153_v1 = vld [vmem:[#allocation10 + $0x114] sm:$0xf0] }
  0x40   :  { %2677 = vst [vmem:[#allocation58_spill] sm:$0xff] %v2143_v2  ;;  %v2155_v15 = vld [vmem:[#allocation10 + $0x124] sm:$0xf]  ;;  %v2157_v11 = vld [vmem:[#allocation10 + $0x120] sm:$0xf] }
  0x41   :  { %2678 = vst [vmem:[#allocation59_spill] sm:$0xff] %v2145_v6  ;;  %v2159_v10 = vld [vmem:[#allocation10 + $0x12c] sm:$0xf]  ;;  %v2161_v7 = vld [vmem:[#allocation10 + $0x128] sm:$0xf] }
  0x42   :  { %2679 = vst [vmem:[#allocation60_spill] sm:$0xff] %v2147_v0  ;;  %v2163_v3 = vld [vmem:[#allocation10 + $0x130] sm:$0xf0]  ;;  %v2165_v2 = vld [vmem:[#allocation10 + $0x12c] sm:$0xf0] }
  0x43   :  { %2680 = vst [vmem:[#allocation61_spill] sm:$0xff] %v2149_v4  ;;  %v2167_v6 = vld [vmem:[#allocation10 + $0x138] sm:$0xf0]  ;;  %v2169_v0 = vld [vmem:[#allocation10 + $0x134] sm:$0xf0] }
  0x44   :  { %2681 = vst [vmem:[#allocation62_spill] sm:$0xff] %v2151_v5  ;;  %v2171_v4 = vld [vmem:[#allocation10 + $0x144] sm:$0xf]  ;;  %v2173_v5 = vld [vmem:[#allocation10 + $0x140] sm:$0xf] }
  0x45   :  { %2682 = vst [vmem:[#allocation63_spill] sm:$0xff] %v2153_v1  ;;  %v2175_v1 = vld [vmem:[#allocation10 + $0x14c] sm:$0xf]  ;;  %v1544_v14 = vld [vmem:[#allocation8 + $0x4] sm:$0xf] }
  0x46   :  { %2683 = vst [vmem:[#allocation64_spill] sm:$0xff] %v2155_v15  ;;  %v2177_v15 = vld [vmem:[#allocation10 + $0x148] sm:$0xf]  ;;  %v1545_v13 = vld [vmem:[#allocation8 + $0xc] sm:$0xf] }
  0x47   :  { %2684 = vst [vmem:[#allocation65_spill] sm:$0xff] %v2157_v11  ;;  %v2179_v11 = vld [vmem:[#allocation10 + $0x150] sm:$0xf0]  ;;  %v1223_v12 = vld [vmem:[#allocation8 + $0x8] sm:$0xf] }
  0x48   :  { %2685 = vst [vmem:[#allocation66_spill] sm:$0xff] %v2159_v10  ;;  %v2181_v10 = vld [vmem:[#allocation10 + $0x14c] sm:$0xf0]  ;;  %v1225_v9 = vld [vmem:[#allocation8 + $0x28] sm:$0xf0] }
  0x49   :  { %2686 = vst [vmem:[#allocation67_spill] sm:$0xff] %v2161_v7  ;;  %v2183_v7 = vld [vmem:[#allocation10 + $0x158] sm:$0xf0]  ;;  %v1231_v22 = vld [vmem:[#allocation8 + $0x10] sm:$0xf] }
  0x4a   :  { %2687 = vst [vmem:[#allocation68_spill] sm:$0xff] %v2163_v3  ;;  %v2185_v3 = vld [vmem:[#allocation10 + $0x154] sm:$0xf0]  ;;  %v1547_v23 = vld [vmem:[#allocation8 + $0x1c] sm:$0xf] }
  0x4b   :  { %2688 = vst [vmem:[#allocation69_spill] sm:$0xff] %v2165_v2  ;;  %v2187_v2 = vld [vmem:[#allocation10 + $0x164] sm:$0xf] }
  0x4c   :  { %2689 = vst [vmem:[#allocation70_spill] sm:$0xff] %v2167_v6  ;;  %v2189_v6 = vld [vmem:[#allocation10 + $0x160] sm:$0xf] }
  0x4d   :  { %2690 = vst [vmem:[#allocation71_spill] sm:$0xff] %v2169_v0  ;;  %v2191_v0 = vld [vmem:[#allocation10 + $0x16c] sm:$0xf] }
  0x4e   :  { %2691 = vst [vmem:[#allocation72_spill] sm:$0xff] %v2171_v4  ;;  %v2193_v4 = vld [vmem:[#allocation10 + $0x168] sm:$0xf] }
  0x4f   :  { %2692 = vst [vmem:[#allocation73_spill] sm:$0xff] %v2173_v5  ;;  %v2195_v5 = vld [vmem:[#allocation10 + $0x170] sm:$0xf0] }
  0x50   :  { %2693 = vst [vmem:[#allocation74_spill] sm:$0xff] %v2175_v1  ;;  %v2197_v1 = vld [vmem:[#allocation10 + $0x16c] sm:$0xf0] }
  0x51   :  { %2694 = vst [vmem:[#allocation75_spill] sm:$0xff] %v2177_v15  ;;  %v2199_v15 = vld [vmem:[#allocation10 + $0x178] sm:$0xf0] }
  0x52   :  { %2695 = vst [vmem:[#allocation76_spill] sm:$0xff] %v2179_v11  ;;  %v2201_v11 = vld [vmem:[#allocation10 + $0x174] sm:$0xf0] }
  0x53   :  { %2696 = vst [vmem:[#allocation77_spill] sm:$0xff] %v2181_v10  ;;  %v2203_v10 = vld [vmem:[#allocation10 + $0x184] sm:$0xf] }
  0x54   :  { %2697 = vst [vmem:[#allocation78_spill] sm:$0xff] %v2183_v7  ;;  %v2205_v7 = vld [vmem:[#allocation10 + $0x180] sm:$0xf] }
  0x55   :  { %2698 = vst [vmem:[#allocation79_spill] sm:$0xff] %v2185_v3  ;;  %v2207_v3 = vld [vmem:[#allocation10 + $0x18c] sm:$0xf] }
  0x56   :  { %2699 = vst [vmem:[#allocation80_spill] sm:$0xff] %v2187_v2  ;;  %v2209_v2 = vld [vmem:[#allocation10 + $0x188] sm:$0xf] }
  0x57   :  { %2700 = vst [vmem:[#allocation81_spill] sm:$0xff] %v2189_v6  ;;  %v2211_v6 = vld [vmem:[#allocation10 + $0x190] sm:$0xf0] }
  0x58   :  { %2701 = vst [vmem:[#allocation82_spill] sm:$0xff] %v2191_v0  ;;  %v2213_v0 = vld [vmem:[#allocation10 + $0x18c] sm:$0xf0] }
  0x59   :  { %2702 = vst [vmem:[#allocation83_spill] sm:$0xff] %v2193_v4  ;;  %v2215_v4 = vld [vmem:[#allocation10 + $0x198] sm:$0xf0] }
  0x5a   :  { %2703 = vst [vmem:[#allocation84_spill] sm:$0xff] %v2195_v5  ;;  %v2217_v5 = vld [vmem:[#allocation10 + $0x194] sm:$0xf0] }
  0x5b   :  { %2704 = vst [vmem:[#allocation85_spill] sm:$0xff] %v2197_v1  ;;  %v2219_v1 = vld [vmem:[#allocation10 + $0x1a4] sm:$0xf] }
  0x5c   :  { %2705 = vst [vmem:[#allocation86_spill] sm:$0xff] %v2199_v15  ;;  %v2221_v15 = vld [vmem:[#allocation10 + $0x1a0] sm:$0xf] }
  0x5d   :  { %2706 = vst [vmem:[#allocation87_spill] sm:$0xff] %v2201_v11  ;;  %v2223_v11 = vld [vmem:[#allocation10 + $0x1ac] sm:$0xf] }
  0x5e   :  { %2707 = vst [vmem:[#allocation88_spill] sm:$0xff] %v2203_v10  ;;  %v2225_v10 = vld [vmem:[#allocation10 + $0x1a8] sm:$0xf] }
  0x5f   :  { %2708 = vst [vmem:[#allocation89_spill] sm:$0xff] %v2205_v7  ;;  %v2227_v7 = vld [vmem:[#allocation10 + $0x1b0] sm:$0xf0] }
  0x60   :  { %2709 = vst [vmem:[#allocation90_spill] sm:$0xff] %v2207_v3  ;;  %v2229_v3 = vld [vmem:[#allocation10 + $0x1ac] sm:$0xf0] }
  0x61   :  { %2710 = vst [vmem:[#allocation91_spill] sm:$0xff] %v2209_v2  ;;  %v2231_v2 = vld [vmem:[#allocation10 + $0x1b8] sm:$0xf0] }
  0x62   :  { %2711 = vst [vmem:[#allocation92_spill] sm:$0xff] %v2211_v6  ;;  %v2233_v6 = vld [vmem:[#allocation10 + $0x1b4] sm:$0xf0] }
  0x63   :  { %2712 = vst [vmem:[#allocation93_spill] sm:$0xff] %v2213_v0  ;;  %v2235_v0 = vld [vmem:[#allocation10 + $0x1c4] sm:$0xf] }
  0x64   :  { %2713 = vst [vmem:[#allocation94_spill] sm:$0xff] %v2215_v4  ;;  %v2237_v4 = vld [vmem:[#allocation10 + $0x1c0] sm:$0xf] }
  0x65   :  { %2714 = vst [vmem:[#allocation95_spill] sm:$0xff] %v2217_v5  ;;  %v2239_v5 = vld [vmem:[#allocation10 + $0x1cc] sm:$0xf] }
  0x66   :  { %2715 = vst [vmem:[#allocation96_spill] sm:$0xff] %v2219_v1  ;;  %v2241_v1 = vld [vmem:[#allocation10 + $0x1c8] sm:$0xf] }
  0x67   :  { %2716 = vst [vmem:[#allocation97_spill] sm:$0xff] %v2221_v15  ;;  %v2243_v15 = vld [vmem:[#allocation10 + $0x1d0] sm:$0xf0] }
  0x68   :  { %2717 = vst [vmem:[#allocation98_spill] sm:$0xff] %v2223_v11  ;;  %v2245_v11 = vld [vmem:[#allocation10 + $0x1cc] sm:$0xf0] }
  0x69   :  { %2718 = vst [vmem:[#allocation99_spill] sm:$0xff] %v2225_v10  ;;  %v2247_v10 = vld [vmem:[#allocation10 + $0x1d8] sm:$0xf0] }
  0x6a   :  { %2719 = vst [vmem:[#allocation100_spill] sm:$0xff] %v2227_v7  ;;  %v2249_v7 = vld [vmem:[#allocation10 + $0x1d4] sm:$0xf0] }
  0x6b   :  { %2720 = vst [vmem:[#allocation101_spill] sm:$0xff] %v2229_v3  ;;  %v2251_v3 = vld [vmem:[#allocation10 + $0x1e4] sm:$0xf] }
  0x6c   :  { %2721 = vst [vmem:[#allocation102_spill] sm:$0xff] %v2231_v2  ;;  %v2253_v2 = vld [vmem:[#allocation10 + $0x1e0] sm:$0xf] }
  0x6d   :  { %2722 = vst [vmem:[#allocation103_spill] sm:$0xff] %v2233_v6  ;;  %v2255_v6 = vld [vmem:[#allocation10 + $0x1ec] sm:$0xf] }
  0x6e   :  { %2723 = vst [vmem:[#allocation104_spill] sm:$0xff] %v2235_v0  ;;  %v2257_v0 = vld [vmem:[#allocation10 + $0x1e8] sm:$0xf] }
  0x6f   :  { %2724 = vst [vmem:[#allocation105_spill] sm:$0xff] %v2237_v4  ;;  %v2259_v4 = vld [vmem:[#allocation10 + $0x1f0] sm:$0xf0] }
  0x70   :  { %2725 = vst [vmem:[#allocation106_spill] sm:$0xff] %v2239_v5  ;;  %v2261_v5 = vld [vmem:[#allocation10 + $0x1ec] sm:$0xf0] }
  0x71   :  { %2726 = vst [vmem:[#allocation107_spill] sm:$0xff] %v2241_v1  ;;  %v2263_v1 = vld [vmem:[#allocation10 + $0x1f8] sm:$0xf0] }
  0x72   :  { %2727 = vst [vmem:[#allocation108_spill] sm:$0xff] %v2243_v15  ;;  %v2265_v15 = vld [vmem:[#allocation10 + $0x1f4] sm:$0xf0] }
  0x73   :  { %2728 = vst [vmem:[#allocation109_spill] sm:$0xff] %v2245_v11  ;;  %v1215_v11 = vld [vmem:[#allocation8] sm:$0xf] }
  0x74   :  { %2729 = vst [vmem:[#allocation110_spill] sm:$0xff] %v2247_v10  ;;  %v1548_v10 = vld [vmem:[#allocation8 + $0x1c] sm:$0xf0] }
  0x75   :  { %2730 = vst [vmem:[#allocation111_spill] sm:$0xff] %v2249_v7  ;;  %v1217_v7 = vld [vmem:[#allocation8 + $0x20] sm:$0xf0]  ;;  %v1216_v8 = vor.u32 %v1548_v10, %v1215_v11  ;;  %v1550_v10 = vld [vmem:[#allocation8 + $0x2c] sm:$0xf0] }
  0x76   :  { %2731 = vst [vmem:[#allocation112_spill] sm:$0xff] %v2251_v3  ;;  %v1220_v3 = vor.u32 %v1544_v14, %v1217_v7  ;;  %v1546_v7 = vld [vmem:[#allocation8 + $0x14] sm:$0xf]  ;;  %v1232_v11 = vor.u32 %v1550_v10, %v1231_v22 }
  0x77   :  { %2732 = vst [vmem:[#allocation113_spill] sm:$0xff] %v2253_v2  ;;  %v1549_v2 = vld [vmem:[#allocation8 + $0x24] sm:$0xf0]  ;;  %197 = vmatpush.bf16.msra.mxu0 %v1216_v8  ;;  %v1233_v14 = vld [vmem:[#allocation8 + $0x30] sm:$0xf0] }
  0x78   :  { %2733 = vst [vmem:[#allocation114_spill] sm:$0xff] %v2255_v6  ;;  %v1224_v6 = vor.u32 %v1549_v2, %v1223_v12  ;;  %221 = vmatpush.bf16.msra.mxu1 %v1220_v3  ;;  %v1236_v2 = vor.u32 %v1546_v7, %v1233_v14  ;;  %v1543_v3 = vld [vmem:[#allocation5 + $0x10] sm:$0xff] }
  0x79   :  { %2734 = vst [vmem:[#allocation115_spill] sm:$0xff] %v2257_v0  ;;  %v1541_v0 = vld [vmem:[#allocation5] sm:$0xff] }
  0x7a   :  { %2735 = vst [vmem:[#allocation116_spill] sm:$0xff] %v2259_v4  ;;  %v1239_v4 = vld [vmem:[#allocation8 + $0x18] sm:$0xf]  ;;  %245 = vmatpush.bf16.msra.mxu2 %v1224_v6  ;;  %1245 = vmatmul.msk.bf16.vlgmr.msra.gmra.mxu0 %vm180_vm0, %v1541_v0 }
  0x7b   :  { %2736 = vst [vmem:[#allocation117_spill] sm:$0xff] %v2261_v5  ;;  %v1228_v5 = vor.u32 %v1545_v13, %v1225_v9  ;;  %1248 = vmatmul.msk.bf16.vlgmr.msra.gmra.mxu1 %vm180_vm0, %v1541_v0  ;;  %293 = vmatpush.bf16.msrb.mxu0 %v1232_v11 }
  0x7c   :  { %2737 = vst [vmem:[#allocation118_spill] sm:$0xff] %v2263_v1  ;;  %v1551_v1 = vld [vmem:[#allocation8 + $0x34] sm:$0xf0]  ;;  %317 = vmatpush.bf16.msrb.mxu1 %v1236_v2 }
  0x7d   :  { %2738 = vst [vmem:[#allocation119_spill] sm:$0xff] %v2265_v15  ;;  %v1241_v15 = vld [vmem:[#allocation8 + $0x38] sm:$0xf0]  ;;  %v1240_v19 = vor.u32 %v1551_v1, %v1239_v4  ;;  %269 = vmatpush.bf16.msra.mxu3 %v1228_v5  ;;  %1251 = vmatmul.msk.bf16.vlgmr.msra.gmra.mxu2 %vm180_vm0, %v1541_v0  ;;  %v1542_v1 = vld [vmem:[#allocation5 + $0x8] sm:$0xff]  ;;  %v2291_v4 = vld [vmem:[#allocation11] sm:$0xff] }
  0x7e   :  { %v1244_v18 = vor.u32 %v1547_v23, %v1241_v15  ;;  %v2297_v5 = vperm.slane %v2291_v4, 1  ;;  %v2302_v13 = vperm.slane %v2291_v4, 2  ;;  %v2305_v15 = vperm.slane %v2291_v4, 3 }
  0x7f   :  { %341 = vmatpush.bf16.msrb.mxu2 %v1240_v19 }
  0x80   :  { %1254 = vmatmul.msk.bf16.vlgmr.msra.gmra.mxu3 %vm180_vm0, %v1541_v0 }
  0x81   :  { %365 = vmatpush.bf16.msrb.mxu3 %v1244_v18 }
  0x8a   :  { %1246 = vmatmul.msk.bf16.gmra.mxu0 %vm180_vm0, %v1542_v1 }
  0x8b   :  { %1249 = vmatmul.msk.bf16.gmra.mxu1 %vm180_vm0, %v1542_v1 }
  0x8d   :  { %1252 = vmatmul.msk.bf16.gmra.mxu2 %vm180_vm0, %v1542_v1 }
  0x90   :  { %1255 = vmatmul.msk.bf16.gmra.mxu3 %vm180_vm0, %v1542_v1 }
  0x9a   :  { %1247 = vmatmul.msk.bf16.gmra.mxu0 %vm180_vm0, %v1543_v3 }
  0x9b   :  { %1250 = vmatmul.msk.bf16.gmra.mxu1 %vm180_vm0, %v1543_v3 }
  0x9d   :  { %1253 = vmatmul.msk.bf16.gmra.mxu2 %vm180_vm0, %v1543_v3 }
  0xa0   :  { %1256 = vmatmul.msk.bf16.gmra.mxu3 %vm180_vm0, %v1543_v3 }
  0xaa   :  { %1257 = vmatmul.msk.bf16.vlgmr.msrb.gmra.mxu0 %vm180_vm0, %v1541_v0 }
  0xab   :  { %1260 = vmatmul.msk.bf16.vlgmr.msrb.gmra.mxu1 %vm180_vm0, %v1541_v0 }
  0xad   :  { %1263 = vmatmul.msk.bf16.vlgmr.msrb.gmra.mxu2 %vm180_vm0, %v1541_v0 }
  0xb0   :  { %1266 = vmatmul.msk.bf16.vlgmr.msrb.gmra.mxu3 %vm180_vm0, %v1541_v0  ;;  %v2294_v0 = vperm.slane %v2291_v4, 0 }
  0xba   :  { %1258 = vmatmul.msk.bf16.gmra.mxu0 %vm180_vm0, %v1542_v1 }
  0xbb   :  { %1261 = vmatmul.msk.bf16.gmra.mxu1 %vm180_vm0, %v1542_v1 }
  0xbd   :  { %1264 = vmatmul.msk.bf16.gmra.mxu2 %vm180_vm0, %v1542_v1 }
  0xc0   :  { %1267 = vmatmul.msk.bf16.gmra.mxu3 %vm180_vm0, %v1542_v1 }
  0xca   :  { %1259 = vmatmul.msk.bf16.gmra.mxu0 %vm180_vm0, %v1543_v3 }
  0xcb   :  { %1262 = vmatmul.msk.bf16.gmra.mxu1 %vm180_vm0, %v1543_v3 }
  0xcd   :  { %1265 = vmatmul.msk.bf16.gmra.mxu2 %vm180_vm0, %v1543_v3 }
  0xd0   :  { %1268 = vmatmul.msk.bf16.gmra.mxu3 %vm180_vm0, %v1543_v3 }
  0xf7   :  { %v199_v6 = vpop.f32.mrf.mxu0 }
  0xf8   :  { %v223_v8 = vpop.f32.mrf.mxu1  ;;  %v200_v9 = vadd.f32 %v199_v6, %v2294_v0 }
  0xf9   :  { %v224_v12 = vadd.f32 %v223_v8, %v2297_v5 }
  0xfa   :  { %382 = vst [vmem:[#allocation2] sm:$0xff] %v200_v9 }
  0xfb   :  { %383 = vst [vmem:[#allocation2 + $0x8] sm:$0xff] %v224_v12 }
  0xff   :  { %v201_v23 = vpop.f32.mrf.mxu0 }
 0x100   :  { %v247_v18 = vpop.f32.mrf.mxu2  ;;  %v202_v7 = vadd.f32 %v201_v23, %v2294_v0  ;;  %v225_v11 = vpop.f32.mrf.mxu1 }
 0x101   :  { %v248_v19 = vadd.f32 %v247_v18, %v2302_v13  ;;  %v226_v14 = vadd.f32 %v225_v11, %v2297_v5 }
 0x102   :  { %390 = vst [vmem:[#allocation2 + $0x40] sm:$0xff] %v202_v7 }
 0x103   :  { %v271_v22 = vpop.f32.mrf.mxu3  ;;  %384 = vst [vmem:[#allocation2 + $0x10] sm:$0xff] %v248_v19 }
 0x104   :  { %v272_v10 = vadd.f32 %v271_v22, %v2305_v15  ;;  %391 = vst [vmem:[#allocation2 + $0x48] sm:$0xff] %v226_v14 }
 0x106   :  { %385 = vst [vmem:[#allocation2 + $0x18] sm:$0xff] %v272_v10 }
 0x107   :  { %v204_v6 = vpop.f32.mrf.mxu0 }
 0x108   :  { %v249_v2 = vpop.f32.mrf.mxu2  ;;  %v205_v9 = vadd.f32 %v204_v6, %v2294_v0  ;;  %v228_v12 = vpop.f32.mrf.mxu1 }
 0x109   :  { %v250_v1 = vadd.f32 %v249_v2, %v2302_v13  ;;  %v229_v18 = vadd.f32 %v228_v12, %v2297_v5 }
 0x10a   :  { %398 = vst [vmem:[#allocation2 + $0x80] sm:$0xff] %v205_v9 }
 0x10b   :  { %v273_v3 = vpop.f32.mrf.mxu3  ;;  %392 = vst [vmem:[#allocation2 + $0x50] sm:$0xff] %v250_v1 }
 0x10c   :  { %v274_v8 = vadd.f32 %v273_v3, %v2305_v15  ;;  %399 = vst [vmem:[#allocation2 + $0x88] sm:$0xff] %v229_v18 }
 0x10e   :  { %393 = vst [vmem:[#allocation2 + $0x58] sm:$0xff] %v274_v8 }
 0x10f   :  { %v206_v10 = vpop.f32.mrf.mxu0 }
 0x110   :  { %v252_v19 = vpop.f32.mrf.mxu2  ;;  %v207_v11 = vadd.f32 %v206_v10, %v2294_v0  ;;  %v230_v14 = vpop.f32.mrf.mxu1 }
 0x111   :  { %v253_v22 = vadd.f32 %v252_v19, %v2302_v13  ;;  %v231_v2 = vadd.f32 %v230_v14, %v2297_v5 }
 0x112   :  { %406 = vst [vmem:[#allocation2 + $0xc0] sm:$0xff] %v207_v11 }
 0x113   :  { %v276_v23 = vpop.f32.mrf.mxu3  ;;  %400 = vst [vmem:[#allocation2 + $0x90] sm:$0xff] %v253_v22 }
 0x114   :  { %v277_v7 = vadd.f32 %v276_v23, %v2305_v15  ;;  %407 = vst [vmem:[#allocation2 + $0xc8] sm:$0xff] %v231_v2 }
 0x116   :  { %401 = vst [vmem:[#allocation2 + $0x98] sm:$0xff] %v277_v7 }
 0x117   :  { %v209_v8 = vpop.f32.mrf.mxu0 }
 0x118   :  { %v254_v1 = vpop.f32.mrf.mxu2  ;;  %v210_v12 = vadd.f32 %v209_v8, %v2294_v0  ;;  %v233_v18 = vpop.f32.mrf.mxu1 }
 0x119   :  { %v255_v3 = vadd.f32 %v254_v1, %v2302_v13  ;;  %v234_v19 = vadd.f32 %v233_v18, %v2297_v5 }
 0x11a   :  { %414 = vst [vmem:[#allocation2 + $0x100] sm:$0xff] %v210_v12 }
 0x11b   :  { %v278_v6 = vpop.f32.mrf.mxu3  ;;  %408 = vst [vmem:[#allocation2 + $0xd0] sm:$0xff] %v255_v3  ;;  %v2328_v3 = vperm.slane %v2291_v4, 4 }
 0x11c   :  { %v279_v9 = vadd.f32 %v278_v6, %v2305_v15  ;;  %415 = vst [vmem:[#allocation2 + $0x108] sm:$0xff] %v234_v19  ;;  %v2331_v6 = vperm.slane %v2291_v4, 5 }
 0x11e   :  { %409 = vst [vmem:[#allocation2 + $0xd8] sm:$0xff] %v279_v9 }
 0x11f   :  { %v211_v7 = vpop.f32.mrf.mxu0 }
 0x120   :  { %v257_v22 = vpop.f32.mrf.mxu2  ;;  %v212_v14 = vadd.f32 %v211_v7, %v2294_v0  ;;  %v235_v2 = vpop.f32.mrf.mxu1 }
 0x121   :  { %v258_v23 = vadd.f32 %v257_v22, %v2302_v13  ;;  %v236_v1 = vadd.f32 %v235_v2, %v2297_v5 }
 0x122   :  { %422 = vst [vmem:[#allocation2 + $0x140] sm:$0xff] %v212_v14 }
 0x123   :  { %v281_v10 = vpop.f32.mrf.mxu3  ;;  %416 = vst [vmem:[#allocation2 + $0x110] sm:$0xff] %v258_v23  ;;  %v2338_v23 = vperm.slane %v2291_v4, 6 }
 0x124   :  { %v282_v11 = vadd.f32 %v281_v10, %v2305_v15  ;;  %423 = vst [vmem:[#allocation2 + $0x148] sm:$0xff] %v236_v1  ;;  %v2341_v10 = vperm.slane %v2291_v4, 7 }
 0x126   :  { %417 = vst [vmem:[#allocation2 + $0x118] sm:$0xff] %v282_v11 }
 0x127   :  { %v295_v18 = vpop.f32.mrf.mxu0 }
 0x128   :  { %v259_v8 = vpop.f32.mrf.mxu2  ;;  %v296_v19 = vadd.f32 %v295_v18, %v2328_v3  ;;  %v319_v22 = vpop.f32.mrf.mxu1 }
 0x129   :  { %v260_v9 = vadd.f32 %v259_v8, %v2302_v13  ;;  %v320_v5 = vadd.f32 %v319_v22, %v2331_v6 }
 0x12a   :  { %386 = vst [vmem:[#allocation2 + $0x20] sm:$0xff] %v296_v19 }
 0x12b   :  { %v283_v12 = vpop.f32.mrf.mxu3  ;;  %424 = vst [vmem:[#allocation2 + $0x150] sm:$0xff] %v260_v9 }
 0x12c   :  { %v284_v0 = vadd.f32 %v283_v12, %v2305_v15  ;;  %387 = vst [vmem:[#allocation2 + $0x28] sm:$0xff] %v320_v5  ;;  %v495_v5 = vlaneseq }
 0x12e   :  { %425 = vst [vmem:[#allocation2 + $0x158] sm:$0xff] %v284_v0 }
 0x12f   :  { %v297_v15 = vpop.f32.mrf.mxu0 }
 0x130   :  { %v343_v13 = vpop.f32.mrf.mxu2  ;;  %v298_v2 = vadd.f32 %v297_v15, %v2328_v3  ;;  %v321_v1 = vpop.f32.mrf.mxu1 }
 0x131   :  { %v344_v7 = vadd.f32 %v343_v13, %v2338_v23  ;;  %v322_v8 = vadd.f32 %v321_v1, %v2331_v6 }
 0x132   :  { %394 = vst [vmem:[#allocation2 + $0x60] sm:$0xff] %v298_v2 }
 0x133   :  { %v367_v11 = vpop.f32.mrf.mxu3  ;;  %388 = vst [vmem:[#allocation2 + $0x30] sm:$0xff] %v344_v7  ;;  %v2351_v7 = vshrl.u32 %v495_v5, 7 }
 0x134   :  { %v368_v14 = vadd.f32 %v367_v11, %v2341_v10  ;;  %395 = vst [vmem:[#allocation2 + $0x68] sm:$0xff] %v322_v8 }
 0x136   :  { %389 = vst [vmem:[#allocation2 + $0x38] sm:$0xff] %v368_v14 }
 0x137   :  { %v300_v18 = vpop.f32.mrf.mxu0 }
 0x138   :  { %v345_v9 = vpop.f32.mrf.mxu2  ;;  %v301_v19 = vadd.f32 %v300_v18, %v2328_v3  ;;  %v324_v22 = vpop.f32.mrf.mxu1 }
 0x139   :  { %v346_v4 = vadd.f32 %v345_v9, %v2338_v23  ;;  %v325_v13 = vadd.f32 %v324_v22, %v2331_v6 }
 0x13a   :  { %402 = vst [vmem:[#allocation2 + $0xa0] sm:$0xff] %v301_v19 }
 0x13b   :  { %v369_v12 = vpop.f32.mrf.mxu3  ;;  %396 = vst [vmem:[#allocation2 + $0x70] sm:$0xff] %v346_v4 }
 0x13c   :  { %v370_v0 = vadd.f32 %v369_v12, %v2341_v10  ;;  %403 = vst [vmem:[#allocation2 + $0xa8] sm:$0xff] %v325_v13 }
 0x13e   :  { %397 = vst [vmem:[#allocation2 + $0x78] sm:$0xff] %v370_v0 }
 0x13f   :  { %v302_v2 = vpop.f32.mrf.mxu0 }
 0x140   :  { %v348_v11 = vpop.f32.mrf.mxu2  ;;  %v303_v8 = vadd.f32 %v302_v2, %v2328_v3  ;;  %v326_v9 = vpop.f32.mrf.mxu1 }
 0x141   :  { %v349_v15 = vadd.f32 %v348_v11, %v2338_v23  ;;  %v327_v4 = vadd.f32 %v326_v9, %v2331_v6 }
 0x142   :  { %410 = vst [vmem:[#allocation2 + $0xe0] sm:$0xff] %v303_v8 }
 0x143   :  { %v372_v14 = vpop.f32.mrf.mxu3  ;;  %404 = vst [vmem:[#allocation2 + $0xb0] sm:$0xff] %v349_v15 }
 0x144   :  { %v373_v1 = vadd.f32 %v372_v14, %v2341_v10  ;;  %411 = vst [vmem:[#allocation2 + $0xe8] sm:$0xff] %v327_v4 }
 0x146   :  { %405 = vst [vmem:[#allocation2 + $0xb8] sm:$0xff] %v373_v1 }
 0x147   :  { %v305_v19 = vpop.f32.mrf.mxu0 }
 0x148   :  { %v350_v12 = vpop.f32.mrf.mxu2  ;;  %v306_v5 = vadd.f32 %v305_v19, %v2328_v3  ;;  %v329_v13 = vpop.f32.mrf.mxu1 }
 0x149   :  { %v351_v18 = vadd.f32 %v350_v12, %v2338_v23  ;;  %v330_v11 = vadd.f32 %v329_v13, %v2331_v6  ;;  %v2369_v13 = vmov 0.0  }
 0x14a   :  { %418 = vst [vmem:[#allocation2 + $0x120] sm:$0xff] %v306_v5  ;;  %v2367_v5 = vmov 0.0  }
 0x14b   :  { %v374_v0 = vpop.f32.mrf.mxu3  ;;  %412 = vst [vmem:[#allocation2 + $0xf0] sm:$0xff] %v351_v18 }
 0x14c   :  { %v375_v22 = vadd.f32 %v374_v0, %v2341_v10  ;;  %419 = vst [vmem:[#allocation2 + $0x128] sm:$0xff] %v330_v11  ;;  %v2373_v11 = vmov 0.0  }
 0x14e   :  { %413 = vst [vmem:[#allocation2 + $0xf8] sm:$0xff] %v375_v22 }
 0x14f   :  { %v307_v1 = vpop.f32.mrf.mxu0 }
 0x150   :  { %v353_v15 = vpop.f32.mrf.mxu2  ;;  %v308_v9 = vadd.f32 %v307_v1, %v2328_v3  ;;  %v331_v4 = vpop.f32.mrf.mxu1  ;;  %v2371_v3 = vmov 0.0  }
 0x151   :  { %v354_v14 = vadd.f32 %v353_v15, %v2338_v23  ;;  %v332_v12 = vadd.f32 %v331_v4, %v2331_v6 }
 0x152   :  { %426 = vst [vmem:[#allocation2 + $0x160] sm:$0xff] %v308_v9 }
 0x153   :  { %v377_v2 = vpop.f32.mrf.mxu3  ;;  %420 = vst [vmem:[#allocation2 + $0x130] sm:$0xff] %v354_v14 }
 0x154   :  { %v378_v8 = vadd.f32 %v377_v2, %v2341_v10  ;;  %427 = vst [vmem:[#allocation2 + $0x168] sm:$0xff] %v332_v12 }
 0x156   :  { %421 = vst [vmem:[#allocation2 + $0x138] sm:$0xff] %v378_v8 }
 0x158   :  { %v355_v18 = vpop.f32.mrf.mxu2 }
 0x159   :  { %v356_v0 = vadd.f32 %v355_v18, %v2338_v23 }
 0x15b   :  { %v379_v19 = vpop.f32.mrf.mxu3  ;;  %428 = vst [vmem:[#allocation2 + $0x170] sm:$0xff] %v356_v0 }
 0x15c   :  { %v380_v22 = vadd.f32 %v379_v19, %v2341_v10 }
 0x15e   :  { %429 = vst [vmem:[#allocation2 + $0x178] sm:$0xff] %v380_v22 }
 0x15f LB: > { %v1390_v6 = vor.u32 %v2133_v61, %v2125_v57  ;;  %v1394_v23 = vor.u32 %v2123_v56, %v2131_v60  ;;  %v1402_v10 = vor.u32 %v2127_v58, %v2135_v62  ;;  %v1398_v15 = vor.u32 %v2137_v63, %v2129_v59  ;;  %v2739_v32 = vld [vmem:[#allocation55_spill] sm:$0xff]  ;;  %v2740_v25 = vld [vmem:[#allocation48_spill] sm:$0xff]  ;;  %v2744_v30 = vld [vmem:[#allocation53_spill] sm:$0xff]  ;;  %s1269_s4 = sshll.u32 %s1938_s3, 3  ;;  %s507_s8 = ssub.s32 5, %s1938_s3  ;;  %s1938_s3 = sphi %s2375_s3, %s502_s3   ;;  %v1934_v11 = vphi %v2373_v11, %v2851_v11   ;;  %v1930_v3 = vphi %v2371_v3, %v2850_v3   ;;  %v1926_v13 = vphi %v2369_v13, %v2849_v13   ;;  %v1922_v5 = vphi %v2367_v5, %v2848_v5  }
 0x160   : > { %v1374_v14 = vor.u32 %v2117_v53, %v2109_v49  ;;  %v1378_v2 = vor.u32 %v2107_v48, %v2115_v52  ;;  %v1386_v1 = vor.u32 %v2111_v50, %v2119_v54  ;;  %v1382_v8 = vor.u32 %v2121_v55, %v2113_v51  ;;  %v2741_v29 = vld [vmem:[#allocation52_spill] sm:$0xff]  ;;  %v2742_v28 = vld [vmem:[#allocation51_spill] sm:$0xff]  ;;  %v2745_v26 = vld [vmem:[#allocation49_spill] sm:$0xff]  ;;  %s510_s28 = sshra.s32 %s1269_s4, 3  ;;  %s2530_s9 = sshll.u32 %s507_s8, 3 }
 0x161   : > { %695 = vmatpush.bf16.msra.mxu0 %v1390_v6  ;;  %708 = vmatpush.bf16.msra.mxu1 %v1394_v23  ;;  %v1358_v9 = vor.u32 %v2101_v45, %v2093_v41  ;;  %v1362_v4 = vor.u32 %v2091_v40, %v2099_v44  ;;  %v1370_v12 = vor.u32 %v2095_v42, %v2103_v46  ;;  %v2743_v24 = vld [vmem:[#allocation47_spill] sm:$0xff]  ;;  %v2746_v27 = vld [vmem:[#allocation50_spill] sm:$0xff]  ;;  %v2748_v17 = vld [vmem:[#allocation40_spill] sm:$0xff]  ;;  %s1616_s29 = sshll.u32 %s510_s28, 6  ;;  %s519_s0 = sshra.s32 %s2530_s9, 3 }
 0x162   : > { %734 = vmatpush.bf16.msra.mxu3 %v1402_v10  ;;  %721 = vmatpush.bf16.msra.mxu2 %v1398_v15  ;;  %v1366_v18 = vor.u32 %v2105_v47, %v2097_v43  ;;  %v1342_v0 = vor.u32 %v2085_v37, %v2077_v33  ;;  %v1346_v19 = vor.u32 %v2739_v32, %v2083_v36  ;;  %v2747_v31 = vld [vmem:[#allocation54_spill] sm:$0xff]  ;;  %v2749_v21 = vld [vmem:[#allocation44_spill] sm:$0xff]  ;;  %v2750_v20 = vld [vmem:[#allocation43_spill] sm:$0xff]  ;;  %s514_s30 = scalar_lea.vmem [#allocation2], %s1616_s29  ;;  %s2536_s10 = sld [smem:[#allocation4 + %s1938_s3]] }
 0x163   : > { %v1354_v22 = vor.u32 %v2079_v34, %v2087_v38  ;;  %v1350_v6 = vor.u32 %v2089_v39, %v2081_v35  ;;  %v1326_v23 = vor.u32 %v2741_v29, %v2740_v25  ;;  %v1330_v10 = vor.u32 %v2743_v24, %v2742_v28  ;;  %v2751_v16 = vld [vmem:[#allocation39_spill] sm:$0xff]  ;;  %s1617_s11 = sshll.u32 %s519_s0, 6  ;;  %s1107_s13 = scalar_lea.vmem [#allocation13], %s1269_s4 }
 0x164   : > { %v1338_v15 = vor.u32 %v2745_v26, %v2744_v30  ;;  %s2547_s12 = scalar_lea.vmem [#allocation2], %s1617_s11  ;;  %s2592_s14 = sld [smem:[#allocation4 + %s507_s8]] }
 0x165   : > { %696 = vmatpush.bf16.msra.mxu0 %v1374_v14  ;;  %709 = vmatpush.bf16.msra.mxu1 %v1378_v2  ;;  %v1334_v14 = vor.u32 %v2747_v31, %v2746_v27  ;;  %v1310_v2 = vor.u32 %v2749_v21, %v2748_v17  ;;  %v2760_v17 = vld [vmem:[#allocation37_spill] sm:$0xff]  ;;  %s1112_s15 = scalar_lea.vmem [#allocation13], %s2530_s9  ;;  %s502_s3 = sadd.s32 1, %s1938_s3  }
 0x166   : > { %735 = vmatpush.bf16.msra.mxu3 %v1386_v1  ;;  %722 = vmatpush.bf16.msra.mxu2 %v1382_v8  ;;  %v1314_v1 = vor.u32 %v2751_v16, %v2750_v20  ;;  %v2752_v8 = vld [vmem:[#allocation45_spill] sm:$0xff]  ;;  %v2763_v20 = vld [vmem:[#allocation38_spill] sm:$0xff]  ;;  %p499_p0 = scmp.ge.s32.totalorder %s502_s3, 6  }
 0x167   : > { %v2761_v21 = vld [vmem:[#allocation33_spill] sm:$0xff]  ;;  %s1139_s2 = sshll.u32 (%p499_p0), %s2640_s6, 4  ;;  %s1951_s18 = smov (%p499_p0), [#allocation14]   ;;  %s1140_s2 = int_to_ptr.hbm [resolvable:$true] %s1139_s2 }
 0x168   : > { %v1306_v16 = vor.u32 %v2761_v21, %v2760_v17  ;;  %v2772_v17 = vld [vmem:[#allocation116_spill] sm:$0xff]  ;;  %s1137_s19 = sshll.u32 (%p499_p0), %s1951_s18, 4  ;;  %s1952_s20 = smov (%p499_p0), 128   ;;  %s1138_s19 = int_to_ptr.vmem [resolvable:$true] %s1137_s19 }
 0x169   : > { %697 = vmatpush.bf16.msra.mxu0 %v1358_v9  ;;  %710 = vmatpush.bf16.msra.mxu1 %v1362_v4  ;;  %v2753_v9 = vld [vmem:[#allocation41_spill] sm:$0xff]  ;;  %v2773_v21 = vld [vmem:[#allocation112_spill] sm:$0xff]  ;;  %s1953_s21 = smov (%p499_p0), 8   ;;  %s1954_s22 = smov (%p499_p0), [#allocation13]  }
 0x16a   : > { %736 = vmatpush.bf16.msra.mxu3 %v1370_v12  ;;  %723 = vmatpush.bf16.msra.mxu2 %v1366_v18  ;;  %v1322_v4 = vor.u32 %v2753_v9, %v2752_v8  ;;  %v2754_v12 = vld [vmem:[#allocation42_spill] sm:$0xff]  ;;  %v2765_v9 = vld [vmem:[#allocation28_spill] sm:$0xff]  ;;  %s1124_s1 = sshll.u32 (%p499_p0), %s1954_s22, 4  ;;  %s1126_s25 = sshll.u32 (%p499_p0), %s2639_s5, 4  ;;  %s1125_s1 = int_to_ptr.vmem [resolvable:$true] %s1124_s1  ;;  %s1127_s25 = int_to_ptr.hbm [resolvable:$true] %s1126_s25 }
 0x16b   : > { %v2755_v18 = vld [vmem:[#allocation46_spill] sm:$0xff]  ;;  %s1152_s27 = sshll.u32 (%p499_p0), %s2641_s7, 4  ;;  %s1955_s3 = smov (%p499_p0), [#allocation16]   ;;  %s1153_s27 = int_to_ptr.hbm [resolvable:$true] %s1152_s27 }
 0x16c   :  { %s1150_s4 = sshll.u32 (%p499_p0), %s1955_s3, 4  ;;  %s1151_s4 = int_to_ptr.vmem [resolvable:$true] %s1150_s4 }
 0x16d   : > { %698 = vmatpush.bf16.msra.mxu0 %v1342_v0  ;;  %711 = vmatpush.bf16.msra.mxu1 %v1346_v19  ;;  %v1318_v0 = vor.u32 %v2755_v18, %v2754_v12  ;;  %v2756_v19 = vld [vmem:[#allocation32_spill] sm:$0xff]  ;;  %v2767_v12 = vld [vmem:[#allocation23_spill] sm:$0xff] }
 0x16e   : > { %737 = vmatpush.bf16.msra.mxu3 %v1354_v22  ;;  %724 = vmatpush.bf16.msra.mxu2 %v1350_v6  ;;  %v2757_v22 = vld [vmem:[#allocation36_spill] sm:$0xff] }
 0x16f   : > { %v1294_v6 = vor.u32 %v2757_v22, %v2756_v19  ;;  %v2768_v19 = vld [vmem:[#allocation29_spill] sm:$0xff] }
 0x170   : > { %v2769_v22 = vld [vmem:[#allocation25_spill] sm:$0xff] }
 0x171   : > { %699 = vmatpush.bf16.msra.mxu0 %v1326_v23  ;;  %712 = vmatpush.bf16.msra.mxu1 %v1330_v10  ;;  %v2758_v23 = vld [vmem:[#allocation35_spill] sm:$0xff] }
 0x172   : > { %738 = vmatpush.bf16.msra.mxu3 %v1338_v15  ;;  %725 = vmatpush.bf16.msra.mxu2 %v1334_v14  ;;  %v2759_v10 = vld [vmem:[#allocation31_spill] sm:$0xff]  ;;  %v2762_v15 = vld [vmem:[#allocation34_spill] sm:$0xff]  ;;  %v2764_v14 = vld [vmem:[#allocation24_spill] sm:$0xff] }
 0x173   : > { %v1298_v24 = vor.u32 %v2759_v10, %v2758_v23  ;;  %v1302_v8 = vor.u32 %v2763_v20, %v2762_v15  ;;  %v1290_v23 = vor.u32 %v2769_v22, %v2768_v19  ;;  %v2771_v10 = vld [vmem:[#allocation117_spill] sm:$0xff]  ;;  %v2774_v20 = vld [vmem:[#allocation118_spill] sm:$0xff]  ;;  %v534_v15 = vpack.c.bf16 %v1934_v11, %v1934_v11  ;;  %v2781_v22 = vld [vmem:[#allocation119_spill] sm:$0xff] }
 0x175   : > { %700 = vmatpush.bf16.msra.mxu0 %v1310_v2  ;;  %713 = vmatpush.bf16.msra.mxu1 %v1314_v1  ;;  %v1278_v2 = vor.u32 %v2765_v9, %v2764_v14  ;;  %v2766_v1 = vld [vmem:[#allocation27_spill] sm:$0xff]  ;;  %v2776_v14 = vld [vmem:[#allocation26_spill] sm:$0xff] }
 0x176   : > { %739 = vmatpush.bf16.msra.mxu3 %v1322_v4  ;;  %726 = vmatpush.bf16.msra.mxu2 %v1318_v0  ;;  %v1282_v18 = vor.u32 %v2767_v12, %v2766_v1  ;;  %v2770_v4 = vld [vmem:[#allocation113_spill] sm:$0xff]  ;;  %v1525_v0 = vor.u32 %v2773_v21, %v2772_v17  ;;  %v2783_v17 = vld [vmem:[#allocation104_spill] sm:$0xff] }
 0x177   : > { %v1521_v25 = vor.u32 %v2771_v10, %v2770_v4  ;;  %v2778_v1 = vld [vmem:[#allocation105_spill] sm:$0xff]  ;;  %v2782_v10 = vld [vmem:[#allocation108_spill] sm:$0xff] }
 0x178   : > { %v2779_v12 = vld [vmem:[#allocation109_spill] sm:$0xff]  ;;  %v1509_v21 = vor.u32 %v2783_v17, %v2782_v10  ;;  %v2796_v17 = vld [vmem:[#allocation99_spill] sm:$0xff] }
 0x179   : > { %701 = vmatpush.bf16.msra.mxu0 %v1294_v6  ;;  %714 = vmatpush.bf16.msra.mxu1 %v1298_v24  ;;  %v2775_v6 = vld [vmem:[#allocation114_spill] sm:$0xff]  ;;  %v1505_v19 = vor.u32 %v2779_v12, %v2778_v1 }
 0x17a   : > { %740 = vmatpush.bf16.msra.mxu3 %v1306_v16  ;;  %727 = vmatpush.bf16.msra.mxu2 %v1302_v8  ;;  %v1533_v24 = vor.u32 %v2775_v6, %v2774_v20  ;;  %v2777_v16 = vld [vmem:[#allocation30_spill] sm:$0xff]  ;;  %v2780_v8 = vld [vmem:[#allocation115_spill] sm:$0xff] }
 0x17b   : > { %v1286_v9 = vor.u32 %v2777_v16, %v2776_v14  ;;  %v1529_v4 = vor.u32 %v2781_v22, %v2780_v8  ;;  %v2784_v20 = vld [vmem:[#allocation110_spill] sm:$0xff]  ;;  %v2788_v14 = vld [vmem:[#allocation107_spill] sm:$0xff] }
 0x17c   : > { %v2785_v6 = vld [vmem:[#allocation106_spill] sm:$0xff]  ;;  %v2789_v16 = vld [vmem:[#allocation111_spill] sm:$0xff] }
 0x17d   : > { %702 = vmatpush.bf16.msra.mxu0 %v1278_v2  ;;  %715 = vmatpush.bf16.msra.mxu1 %v1282_v18  ;;  %v1517_v2 = vor.u32 %v2785_v6, %v2784_v20  ;;  %v2787_v18 = vld [vmem:[#allocation101_spill] sm:$0xff]  ;;  %v1513_v1 = vor.u32 %v2789_v16, %v2788_v14  ;;  %v2792_v8 = vld [vmem:[#allocation102_spill] sm:$0xff]  ;;  %v2797_v20 = vld [vmem:[#allocation103_spill] sm:$0xff] }
 0x17e   : > { %741 = vmatpush.bf16.msra.mxu3 %v1290_v23  ;;  %728 = vmatpush.bf16.msra.mxu2 %v1286_v9  ;;  %v2793_v22 = vld [vmem:[#allocation98_spill] sm:$0xff]  ;;  %v2794_v9 = vld [vmem:[#allocation89_spill] sm:$0xff]  ;;  %v1497_v6 = vor.u32 %v2797_v20, %v2796_v17 }
 0x17f   : > { %v1501_v10 = vor.u32 %v2793_v22, %v2792_v8  ;;  %v2801_v14 = vld [vmem:[#allocation90_spill] sm:$0xff]  ;;  %v2806_v22 = vld [vmem:[#allocation84_spill] sm:$0xff]  ;;  %v2810_v20 = vld [vmem:[#allocation73_spill] sm:$0xff] }
 0x180   : > { %703 = vmatmul.bf16.vlgmr.msra.gmra.mxu0 %v534_v15  ;;  %716 = vmatmul.bf16.vlgmr.msra.gmra.mxu1 %v534_v15 }
 0x181   : > { %980 = vmatpush.bf16.msrb.mxu0 %v1521_v25  ;;  %993 = vmatpush.bf16.msrb.mxu1 %v1525_v0  ;;  %v2786_v25 = vld [vmem:[#allocation97_spill] sm:$0xff]  ;;  %v2790_v0 = vld [vmem:[#allocation100_spill] sm:$0xff] }
 0x182   : > { %1019 = vmatpush.bf16.msrb.mxu3 %v1533_v24  ;;  %1006 = vmatpush.bf16.msrb.mxu2 %v1529_v4  ;;  %v1489_v23 = vor.u32 %v2787_v18, %v2786_v25  ;;  %v2791_v24 = vld [vmem:[#allocation96_spill] sm:$0xff]  ;;  %v2800_v18 = vld [vmem:[#allocation94_spill] sm:$0xff] }
 0x183   : > { %742 = vmatmul.bf16.vlgmr.msra.gmra.mxu3 %v534_v15  ;;  %v1493_v12 = vor.u32 %v2791_v24, %v2790_v0  ;;  %729 = vmatmul.bf16.vlgmr.msra.gmra.mxu2 %v534_v15  ;;  %v2798_v25 = vld [vmem:[#allocation92_spill] sm:$0xff]  ;;  %v1485_v16 = vor.u32 %v2801_v14, %v2800_v18  ;;  %v2802_v0 = vld [vmem:[#allocation81_spill] sm:$0xff]  ;;  %v2805_v24 = vld [vmem:[#allocation95_spill] sm:$0xff] }
 0x184   : > { %v2803_v15 = vld [vmem:[#allocation85_spill] sm:$0xff]  ;;  %v2814_v14 = vld [vmem:[#allocation76_spill] sm:$0xff] }
 0x185   : > { %981 = vmatpush.bf16.msrb.mxu0 %v1505_v19  ;;  %994 = vmatpush.bf16.msrb.mxu1 %v1509_v21  ;;  %v2795_v19 = vld [vmem:[#allocation93_spill] sm:$0xff]  ;;  %v2799_v21 = vld [vmem:[#allocation88_spill] sm:$0xff] }
 0x186   : > { %1020 = vmatpush.bf16.msrb.mxu3 %v1517_v2  ;;  %1007 = vmatpush.bf16.msrb.mxu2 %v1513_v1  ;;  %v1473_v4 = vor.u32 %v2795_v19, %v2794_v9  ;;  %v1477_v2 = vor.u32 %v2799_v21, %v2798_v25  ;;  %v2804_v1 = vld [vmem:[#allocation91_spill] sm:$0xff]  ;;  %v2807_v9 = vld [vmem:[#allocation80_spill] sm:$0xff]  ;;  %v2809_v19 = vld [vmem:[#allocation82_spill] sm:$0xff] }
 0x187   : > { %v1481_v8 = vor.u32 %v2805_v24, %v2804_v1  ;;  %v2811_v25 = vld [vmem:[#allocation77_spill] sm:$0xff]  ;;  %v2813_v21 = vld [vmem:[#allocation87_spill] sm:$0xff] }
 0x188   : > { %v2818_v24 = vld [vmem:[#allocation65_spill] sm:$0xff] }
 0x189   : > { %982 = vmatpush.bf16.msrb.mxu0 %v1489_v23  ;;  %995 = vmatpush.bf16.msrb.mxu1 %v1493_v12  ;;  %v1457_v23 = vor.u32 %v2803_v15, %v2802_v0  ;;  %v1461_v12 = vor.u32 %v2807_v9, %v2806_v22  ;;  %v2815_v0 = vld [vmem:[#allocation72_spill] sm:$0xff]  ;;  %v2817_v15 = vld [vmem:[#allocation74_spill] sm:$0xff]  ;;  %v2819_v22 = vld [vmem:[#allocation69_spill] sm:$0xff] }
 0x18a   : > { %1021 = vmatpush.bf16.msrb.mxu3 %v1501_v10  ;;  %1008 = vmatpush.bf16.msrb.mxu2 %v1497_v6  ;;  %v2808_v10 = vld [vmem:[#allocation86_spill] sm:$0xff]  ;;  %v2812_v6 = vld [vmem:[#allocation83_spill] sm:$0xff] }
 0x18b   : > { %v1469_v17 = vor.u32 %v2809_v19, %v2808_v10  ;;  %v1465_v18 = vor.u32 %v2813_v21, %v2812_v6  ;;  %v2821_v9 = vld [vmem:[#allocation79_spill] sm:$0xff]  ;;  %v2822_v19 = vld [vmem:[#allocation68_spill] sm:$0xff]  ;;  %v2826_v21 = vld [vmem:[#allocation57_spill] sm:$0xff] }
 0x18d   : > { %983 = vmatpush.bf16.msrb.mxu0 %v1473_v4  ;;  %996 = vmatpush.bf16.msrb.mxu1 %v1477_v2  ;;  %v1441_v4 = vor.u32 %v2811_v25, %v2810_v20  ;;  %v1445_v2 = vor.u32 %v2815_v0, %v2814_v14  ;;  %v2823_v20 = vld [vmem:[#allocation64_spill] sm:$0xff]  ;;  %v2825_v25 = vld [vmem:[#allocation66_spill] sm:$0xff]  ;;  %v2827_v14 = vld [vmem:[#allocation61_spill] sm:$0xff] }
 0x18e   : > { %1022 = vmatpush.bf16.msrb.mxu3 %v1485_v16  ;;  %1009 = vmatpush.bf16.msrb.mxu2 %v1481_v8  ;;  %v2816_v16 = vld [vmem:[#allocation78_spill] sm:$0xff]  ;;  %v2820_v8 = vld [vmem:[#allocation75_spill] sm:$0xff] }
 0x18f   : > { %v1453_v1 = vor.u32 %v2817_v15, %v2816_v16  ;;  %v1449_v10 = vor.u32 %v2821_v9, %v2820_v8  ;;  %v2829_v0 = vld [vmem:[#allocation71_spill] sm:$0xff]  ;;  %v2831_v15 = vld [vmem:[#allocation56_spill] sm:$0xff] }
 0x190   : > { %v2834_v9 = vld [vmem:[#allocation59_spill] sm:$0xff] }
 0x191   : > { %984 = vmatpush.bf16.msrb.mxu0 %v1457_v23  ;;  %997 = vmatpush.bf16.msrb.mxu1 %v1461_v12  ;;  %v1425_v23 = vor.u32 %v2819_v22, %v2818_v24  ;;  %v1429_v12 = vor.u32 %v2823_v20, %v2822_v19  ;;  %v2832_v24 = vld [vmem:[#allocation62_spill] sm:$0xff]  ;;  %v515_v20 = vld [vmem:[%s514_s30] sm:$0xff] }
 0x192   : > { %1023 = vmatpush.bf16.msrb.mxu3 %v1469_v17  ;;  %1010 = vmatpush.bf16.msrb.mxu2 %v1465_v18  ;;  %v2824_v17 = vld [vmem:[#allocation70_spill] sm:$0xff]  ;;  %v2828_v18 = vld [vmem:[#allocation67_spill] sm:$0xff] }
 0x193   : > { %v1437_v6 = vor.u32 %v2825_v25, %v2824_v17  ;;  %v1433_v16 = vor.u32 %v2829_v0, %v2828_v18  ;;  %v2833_v22 = vld [vmem:[#allocation58_spill] sm:$0xff]  ;;  %v518_v18 = vld [vmem:[%s514_s30 + $0x18] sm:$0xff] }
 0x194   : > { %v1421_v8 = vor.u32 %v2833_v22, %v2832_v24 }
 0x195   : > { %985 = vmatpush.bf16.msrb.mxu0 %v1441_v4  ;;  %998 = vmatpush.bf16.msrb.mxu1 %v1445_v2  ;;  %v1409_v4 = vor.u32 %v2827_v14, %v2826_v21  ;;  %v2830_v2 = vld [vmem:[#allocation60_spill] sm:$0xff] }
 0x196   : > { %1024 = vmatpush.bf16.msrb.mxu3 %v1453_v1  ;;  %1011 = vmatpush.bf16.msrb.mxu2 %v1449_v10  ;;  %v1413_v1 = vor.u32 %v2831_v15, %v2830_v2  ;;  %v2835_v10 = vld [vmem:[#allocation63_spill] sm:$0xff] }
 0x197   : > { %v1417_v19 = vor.u32 %v2835_v10, %v2834_v9  ;;  %v517_v10 = vld [vmem:[%s514_s30 + $0x10] sm:$0xff] }
 0x199   : > { %986 = vmatpush.bf16.msrb.mxu0 %v1425_v23  ;;  %999 = vmatpush.bf16.msrb.mxu1 %v1429_v12  ;;  %v819_v23 = vpack.c.bf16 %v1926_v13, %v1926_v13  ;;  %v516_v12 = vld [vmem:[%s514_s30 + $0x8] sm:$0xff] }
 0x19a   : > { %1025 = vmatpush.bf16.msrb.mxu3 %v1437_v6  ;;  %1012 = vmatpush.bf16.msrb.mxu2 %v1433_v16 }
 0x19d   : > { %987 = vmatpush.bf16.msrb.mxu0 %v1409_v4  ;;  %1000 = vmatpush.bf16.msrb.mxu1 %v1413_v1 }
 0x19e   : > { %1026 = vmatpush.bf16.msrb.mxu3 %v1421_v8  ;;  %1013 = vmatpush.bf16.msrb.mxu2 %v1417_v19 }
 0x1a0   : > { %988 = vmatmul.bf16.vlgmr.msrb.gmra.mxu0 %v819_v23  ;;  %1001 = vmatmul.bf16.vlgmr.msrb.gmra.mxu1 %v819_v23 }
 0x1a1   : > { %1027 = vmatmul.bf16.vlgmr.msrb.gmra.mxu3 %v819_v23  ;;  %1014 = vmatmul.bf16.vlgmr.msrb.gmra.mxu2 %v819_v23 }
 0x1fd   : > { %v704_v17 = vpop.f32.mrf.mxu0  ;;  %v717_v25 = vpop.f32.mrf.mxu1 }
 0x1fe   : > { %v747_v6 = vadd.f32 %v704_v17, %v515_v20  ;;  %v748_v21 = vadd.f32 %v717_v25, %v516_v12 }
 0x200   : > { %v1403_v14 = vmul.f32 -1.442695, %v747_v6  ;;  %v1404_v4 = vmul.f32 -1.442695, %v748_v21 }
 0x202   : > { %1676 = vpow2.f32 %v1403_v14 }
 0x203   : > { %1678 = vpow2.f32 %v1404_v4 }
 0x205   : > { %v706_v2 = vpop.f32.mrf.mxu0  ;;  %v719_v15 = vpop.f32.mrf.mxu1 }
 0x206   : > { %v743_v0 = vpop.f32.mrf.mxu3  ;;  %v730_v24 = vpop.f32.mrf.mxu2 }
 0x207   : > { %v750_v16 = vadd.f32 %v743_v0, %v518_v18  ;;  %v749_v12 = vadd.f32 %v730_v24, %v517_v10 }
 0x208   : > { %v1677_v22 = vpop.eup %1676 }
 0x209   : > { %v1405_v1 = vmul.f32 -1.442695, %v750_v16  ;;  %v1679_v8 = vpop.eup %1678  ;;  %v754_v23 = vadd.f32 1.0, %v1677_v22 }
 0x20a   : > { %v773_v9 = vadd.f32 1.0, %v1679_v8 }
 0x20b   : > { %1680 = vpow2.f32 %v1405_v1  ;;  %vm760_vm1 = vweird.f32 %v754_v23  ;;  %v766_v18 = vand.u32 2147483648, %v754_v23  ;;  %v764_v2 = vand.u32 2147483647, %v754_v23 }
 0x20c   : > { %1682 = vrcp.f32 %v754_v23  ;;  %v785_v16 = vand.u32 2147483648, %v773_v9  ;;  %vm779_vm3 = vweird.f32 %v773_v9  ;;  %v783_v1 = vand.u32 2147483647, %v773_v9 }
 0x20d   : > { %1684 = vrcp.f32 %v773_v9  ;;  %v767_v10 = vor.u32 1.1754944e-38, %v766_v18  ;;  %vm765_vm7 = vcmp.eq.f32.partialorder %v764_v2, 8.507059e+37  ;;  %v529_v18 = vstv %s2536_s10 }
 0x20e   : > { %v745_v19 = vpop.f32.mrf.mxu3  ;;  %v732_v17 = vpop.f32.mrf.mxu2  ;;  %vm784_vm8 = vcmp.eq.f32.partialorder %v783_v1, 8.507059e+37  ;;  %vm2561_vm11 = vcmp.lt.s32.totalorder %v2351_v7, %v529_v18 }
 0x211   : > { %v1681_v20 = vpop.eup %1680 }
 0x212   : > { %v2533_v25 = vadd.f32 1.0, %v1681_v20  ;;  %v1683_v6 = vpop.eup %1682 }
 0x213   : > { %v1685_v21 = vpop.eup %1684  ;;  %v756_v14 = vmul.f32 %v1683_v6, %v754_v23  ;;  %vm761_vm2 = vweird.f32 %v1683_v6  ;;  %v524_v23 = vld [vmem:[%s2547_s12 + $0x20] sm:$0xff] }
 0x214   : > { %1686 = vrcp.f32 %v2533_v25  ;;  %v775_v4 = vmul.f32 %v1685_v21, %v773_v9  ;;  %vm780_vm4 = vweird.f32 %v1685_v21  ;;  %vm2539_vm5 = vmor %vm760_vm1, %vm761_vm2  ;;  %vm799_vm9 = vweird.f32 %v2533_v25 }
 0x215   : > { %1688 = vtanh.f32 %v749_v12  ;;  %v757_v0 = vsub.f32 1.0, %v756_v14  ;;  %vm2543_vm6 = vmor %vm779_vm3, %vm780_vm4  ;;  %v786_v12 = vor.u32 1.1754944e-38, %v785_v16  ;;  %v805_v31 = vand.u32 2147483648, %v2533_v25 }
 0x216   : > { %v776_v15 = vsub.f32 1.0, %v775_v4 }
 0x217   : > { %v758_v24 = vmul.f32 %v1683_v6, %v757_v0  ;;  %v525_v0 = vld [vmem:[%s2547_s12 + $0x28] sm:$0xff] }
 0x218   : > { %v777_v22 = vmul.f32 %v1685_v21, %v776_v15 }
 0x219   : > { %v759_v17 = vadd.f32 %v1683_v6, %v758_v24 }
 0x21a   : > { %v1687_v19 = vpop.eup %1686  ;;  %v778_v4 = vadd.f32 %v1685_v21, %v777_v22 }
 0x21b   : > { %v1689_v9 = vpop.eup %1688  ;;  %v795_v14 = vmul.f32 %v1687_v19, %v2533_v25  ;;  %v763_v15 = vsel %vm2539_vm5, %v1683_v6, %v759_v17  ;;  %vm800_vm10 = vweird.f32 %v1687_v19 }
 0x21c   : > { %v768_v2 = vsel %vm765_vm7, %v767_v10, %v763_v15  ;;  %v782_v26 = vsel %vm2543_vm6, %v1685_v21, %v778_v4  ;;  %v803_v21 = vand.u32 2147483647, %v2533_v25  ;;  %vm2568_vm12 = vmor %vm799_vm9, %vm800_vm10 }
 0x21d   : > { %v989_v16 = vpop.f32.mrf.mxu0  ;;  %v796_v24 = vsub.f32 1.0, %v795_v14  ;;  %v1002_v28 = vpop.f32.mrf.mxu1  ;;  %v787_v29 = vsel %vm784_vm8, %v786_v12, %v782_v26  ;;  %v810_v22 = vmul.f32 %v1689_v9, %v768_v2  ;;  %v527_v12 = vld [vmem:[%s2547_s12 + $0x38] sm:$0xff] }
 0x21e   : > { %v1032_v27 = vadd.f32 %v989_v16, %v524_v23  ;;  %v1033_v1 = vadd.f32 %v1002_v28, %v525_v0  ;;  %v809_v32 = vmul.f32 %v1930_v3, %v787_v29  ;;  %vm804_vm13 = vcmp.eq.f32.partialorder %v803_v21, 8.507059e+37 }
 0x21f   : > { %v797_v30 = vmul.f32 %v1687_v19, %v796_v24 }
 0x220   : > { %v1534_v8 = vmul.f32 -1.442695, %v1032_v27  ;;  %v1535_v10 = vmul.f32 -1.442695, %v1033_v1  ;;  %v811_v28 = vadd.f32 %v810_v22, %v809_v32  ;;  %v806_v27 = vor.u32 1.1754944e-38, %v805_v31 }
 0x221   : > { %v798_v20 = vadd.f32 %v1687_v19, %v797_v30 }
 0x222   : > { %1690 = vpow2.f32 %v1534_v8  ;;  %v2576_v3 = vsel %vm2561_vm11, %v811_v28, %v1930_v3  }
 0x223   : > { %1692 = vpow2.f32 %v1535_v10  ;;  %v2844_v29 = vmov %v2576_v3  ;;  %v802_v30 = vsel %vm2568_vm12, %v1687_v19, %v798_v20  ;;  %v526_v19 = vld [vmem:[%s2547_s12 + $0x30] sm:$0xff] }
 0x224   : > { %1694 = vtanh.f32 %v811_v28  ;;  %v1028_v17 = vpop.f32.mrf.mxu3  ;;  %v807_v4 = vsel %vm804_vm13, %v806_v27, %v802_v30  ;;  %v1015_v0 = vpop.f32.mrf.mxu2  ;;  %1117 = vst [vmem:[#allocation16] sm:$0xff] (%p499_p0), %v2844_v29 }
 0x225   : > { %v1035_v25 = vadd.f32 %v1028_v17, %v527_v12  ;;  %v991_v23 = vpop.f32.mrf.mxu0  ;;  %v1004_v9 = vpop.f32.mrf.mxu1  ;;  %v1034_v21 = vadd.f32 %v1015_v0, %v526_v19 }
 0x227   : > { %v1536_v32 = vmul.f32 -1.442695, %v1035_v25 }
 0x228   : > { %v1691_v14 = vpop.eup %1690 }
 0x229   : > { %v1693_v31 = vpop.eup %1692  ;;  %v1039_v18 = vadd.f32 1.0, %v1691_v14  ;;  %1696 = vpow2.f32 %v1536_v32 }
 0x22a   : > { %v1695_v15 = vpop.eup %1694  ;;  %v1058_v3 = vadd.f32 1.0, %v1693_v31 }
 0x22b   : > { %v813_v16 = vmul.f32 %v1695_v15, %v807_v4  ;;  %1698 = vrcp.f32 %v1039_v18  ;;  %v1051_v17 = vand.u32 2147483648, %v1039_v18  ;;  %v1049_v23 = vand.u32 2147483647, %v1039_v18 }
 0x22c   : > { %1700 = vrcp.f32 %v1058_v3  ;;  %v1030_v24 = vpop.f32.mrf.mxu3  ;;  %v1017_v20 = vpop.f32.mrf.mxu2  ;;  %v1070_v30 = vand.u32 2147483648, %v1058_v3  ;;  %v1068_v32 = vand.u32 2147483647, %v1058_v3  ;;  %v532_v4 = vstv %s2592_s14 }
 0x22d   : > { %v2584_v11 = vsel %vm2561_vm11, %v813_v16, %v1934_v11   ;;  %v818_v22 = vsel %vm2561_vm11, %v813_v16, 0.0  ;;  %vm1045_vm0 = vweird.f32 %v1039_v18  ;;  %vm1064_vm1 = vweird.f32 %v1058_v3 }
 0x22e   : > { %v2845_v2 = vmov %v2584_v11  ;;  %v1104_v1 = vpack.c.bf16 %v818_v22, %v818_v22  ;;  %v1052_v16 = vor.u32 1.1754944e-38, %v1051_v17  ;;  %v1071_v24 = vor.u32 1.1754944e-38, %v1070_v30 }
 0x22f   : > { %v1697_v8 = vpop.eup %1696  ;;  %vm1050_vm4 = vcmp.eq.f32.partialorder %v1049_v23, 8.507059e+37  ;;  %vm1069_vm5 = vcmp.eq.f32.partialorder %v1068_v32, 8.507059e+37  ;;  %vm2597_vm6 = vcmp.lt.s32.totalorder %v2351_v7, %v532_v4  ;;  %1114 = vst [vmem:[#allocation14] sm:$0xff] (%p499_p0), %v2845_v2 }
 0x230   : > { %1108 = vst [vmem:[%s1107_s13] sm:$0xf] %v1104_v1  ;;  %v1078_v10 = vadd.f32 1.0, %v1697_v8 }
 0x231   : > { %v1699_v26 = vpop.eup %1698 }
 0x232   : > { %v1701_v28 = vpop.eup %1700  ;;  %v1041_v12 = vmul.f32 %v1699_v26, %v1039_v18  ;;  %1702 = vrcp.f32 %v1078_v10  ;;  %vm1046_vm14 = vweird.f32 %v1699_v26  ;;  %vm1084_vm8 = vweird.f32 %v1078_v10 }
 0x233   : > { %v1060_v11 = vmul.f32 %v1701_v28, %v1058_v3  ;;  %1704 = vtanh.f32 %v1034_v21  ;;  %vm1065_vm15 = vweird.f32 %v1701_v28  ;;  %vm1047_vm2 = vmor %vm1045_vm0, %vm1046_vm14  ;;  %v1088_v17 = vand.u32 2147483647, %v1078_v10 }
 0x234   : > { %v1042_v6 = vsub.f32 1.0, %v1041_v12  ;;  %vm1066_vm3 = vmor %vm1064_vm1, %vm1065_vm15 }
 0x235   : > { %v1061_v27 = vsub.f32 1.0, %v1060_v11  ;;  %vm1089_vm10 = vcmp.eq.f32.partialorder %v1088_v17, 8.507059e+37 }
 0x236   : > { %v1043_v25 = vmul.f32 %v1699_v26, %v1042_v6 }
 0x237   : > { %v1062_v9 = vmul.f32 %v1701_v28, %v1061_v27 }
 0x238   : > { %v1703_v14 = vpop.eup %1702  ;;  %v1044_v0 = vadd.f32 %v1699_v26, %v1043_v25 }
 0x239   : > { %v1705_v31 = vpop.eup %1704  ;;  %v1080_v15 = vmul.f32 %v1703_v14, %v1078_v10  ;;  %v1063_v19 = vadd.f32 %v1701_v28, %v1062_v9  ;;  %vm1085_vm7 = vweird.f32 %v1703_v14 }
 0x23a   : > { %v1048_v22 = vsel %vm1047_vm2, %v1699_v26, %v1044_v0  ;;  %v1090_v26 = vand.u32 2147483648, %v1078_v10  ;;  %vm1086_vm9 = vmor %vm1084_vm8, %vm1085_vm7 }
 0x23b   : > { %v1081_v1 = vsub.f32 1.0, %v1080_v15  ;;  %v1053_v8 = vsel %vm1050_vm4, %v1052_v16, %v1048_v22  ;;  %v1067_v21 = vsel %vm1066_vm3, %v1701_v28, %v1063_v19 }
 0x23c   : > { %v1072_v20 = vsel %vm1069_vm5, %v1071_v24, %v1067_v21  ;;  %v1095_v12 = vmul.f32 %v1705_v31, %v1053_v8  ;;  %v1091_v25 = vor.u32 1.1754944e-38, %v1090_v26 }
 0x23d   : > { %v1082_v11 = vmul.f32 %v1703_v14, %v1081_v1  ;;  %v1094_v6 = vmul.f32 %v1922_v5, %v1072_v20 }
 0x23f   : > { %v1096_v3 = vadd.f32 %v1095_v12, %v1094_v6  ;;  %v1083_v27 = vadd.f32 %v1703_v14, %v1082_v11  ;;  %v2851_v11 = vmov %v2845_v2 }
 0x241   : > { %1706 = vtanh.f32 %v1096_v3  ;;  %v1102_v28 = vsel %vm2597_vm6, %v1096_v3, %v1922_v5   ;;  %v1087_v30 = vsel %vm1086_vm9, %v1703_v14, %v1083_v27  ;;  %v2850_v3 = vmov %v2844_v29 }
 0x242   : > { %v1092_v9 = vsel %vm1089_vm10, %v1091_v25, %v1087_v30  ;;  %v2848_v5 = vmov %v1102_v28  ;;  %1119 = vst [vmem:[#allocation16 + $0x8] sm:$0xff] (%p499_p0), %v1102_v28 }
 0x247   : > { %v1707_v23 = vpop.eup %1706 }
 0x248   : > { %v1098_v32 = vmul.f32 %v1707_v23, %v1092_v9 }
 0x249   :  { %501 = sbr.rel (!%p499_p0) target bundleno = 351 (0x15f), region = 82 }
 0x24a   : > { %v1101_v4 = vsel %vm2597_vm6, %v1098_v32, %v1926_v13   ;;  %v1103_v0 = vsel %vm2597_vm6, %v1098_v32, 0.0 }
 0x24b   : > { %v1109_v31 = vpack.c.bf16 %v1103_v0, %v1103_v0  ;;  %v2849_v13 = vmov %v1101_v4  ;;  %1116 = vst [vmem:[#allocation14 + $0x8] sm:$0xff] (%p499_p0), %v1101_v4 }
 0x24c   :  { %1145 = dma.vmem_to_hbm [thread:$0]  (%p499_p0), %s1138_s19, 256, %s1140_s2, [#allocation15], %s1952_s20, %s1952_s20, %s1953_s21  }
 0x24d   : > { %1113 = vst [vmem:[%s1112_s15 + $0x4] sm:$0xf] %v1109_v31 }
 0x24e   :  { %1132 = dma.vmem_to_hbm [thread:$0]  %s1125_s1, 768, %s1127_s25, [#allocation7], %s1952_s20, %s1952_s20, %s1953_s21  }
 0x24f   :  { %1158 = dma.vmem_to_hbm [thread:$0]  %s1151_s4, 256, %s1153_s27, [#allocation15], %s1952_s20, %s1952_s20, %s1953_s21  }
 0x250   :  { %1916 = dma.done.wait [#allocation7], 768  }
 0x251   :  { %1917 = vsyncadd [#allocation7], 4294966528 }
 0x252   :  { %1918 = dma.done.wait [#allocation15], 512  }
 0x253   :  { %1919 = vsyncadd [#allocation15], 4294966784 }
 0x254   :  { %1171 = vsyncpa [#allocation6], 1 }
 0x255   :  { %1172 = vsyncpa [#allocation9], 1 }
 0x256   :  { %1173 = vsyncpa [#allocation12], 1 }
 0x257   :  { %1174 = vsyncpa [#allocation7], 1 }
 0x258   :  { %1175 = vsyncpa [#allocation15], 1 }

</bundles_post_ra>
